<compile_context>
chip_gen: v7x
topology: tpu7x:2x2x1
jax: 0.10.0
libtpu: 0.0.40
codegen_flags: <defaults>
</compile_context>

<pallas_src>
import math
from functools import partial

import jax
import jax.numpy as jnp
from jax.experimental import pallas as pl
from jax.experimental.pallas import tpu as pltpu


# Order of (stacked) weight arguments passed to the kernel (after x).
PARAM_ORDER = [
    "wq", "bq", "wk", "bk", "wv", "bv", "wo", "bo",
    "wl", "bl", "wmq", "bmq", "wmk", "bmk",
    "w1", "b1", "w2", "b2",
    "g1", "be1", "g2", "be2",
]
# Matmul weight matrices (cast to compute dtype); biases / LN params stay f32.
WEIGHT_MATS = frozenset({"wq", "wk", "wv", "wo", "wl", "wmq", "wmk", "w1", "w2"})

LN_EPS = 1e-5


def _fused_encoder_kernel(
    x_ref,
    wq_ref, bq_ref, wk_ref, bk_ref, wv_ref, bv_ref, wo_ref, bo_ref,
    wl_ref, bl_ref, wmq_ref, bmq_ref, wmk_ref, bmk_ref,
    w1_ref, b1_ref, w2_ref, b2_ref,
    g1_ref, be1_ref, g2_ref, be2_ref,
    out_ref,
    act_ref,
    *, num_heads, compute_dtype, resident_weights):
    """One grid step = (one batch block) x (one encoder layer)."""
    layer = pl.program_id(1)
    last_layer = pl.num_programs(1) - 1

    # Activation carry: load from the HBM input only at the first layer of this block.
    @pl.when(layer == 0)
    def _():
        act_ref[...] = x_ref[...].astype(jnp.float32)

    Bt, S, D = act_ref.shape
    H = num_heads
    Dh = D // H
    scale = 1.0 / math.sqrt(Dh)
    cd = compute_dtype
    use_approx = jnp.dtype(cd) == jnp.dtype(jnp.bfloat16)

    if resident_weights:
        # Whole stacked (L, ...) weight set is VMEM-resident; pick this layer's slab.
        sel = lambda ref: ref[layer]
    else:
        # Per-layer slab was already selected by the BlockSpec index_map.
        sel = lambda ref: ref[...]

    wq, bq = sel(wq_ref), sel(bq_ref)
    wk, bk = sel(wk_ref), sel(bk_ref)
    wv, bv = sel(wv_ref), sel(bv_ref)
    wo, bo = sel(wo_ref), sel(bo_ref)
    wl, bl = sel(wl_ref), sel(bl_ref)
    wmq, bmq = sel(wmq_ref), sel(bmq_ref)
    wmk, bmk = sel(wmk_ref), sel(bmk_ref)
    w1, b1 = sel(w1_ref), sel(b1_ref)
    w2, b2 = sel(w2_ref), sel(b2_ref)
    g1, be1 = sel(g1_ref), sel(be1_ref)
    g2, be2 = sel(g2_ref), sel(be2_ref)

    # Flatten (Bt, S, D) -> (Bt*S, D): tall M for every position-wise matmul.
    x2 = act_ref[...].reshape(Bt * S, D)                          # f32

    def linear(v, w, b):
        # Matmul operands in compute dtype, f32 accumulation, f32 bias add.
        return jnp.dot(v.astype(cd), w, preferred_element_type=jnp.float32) + b

    # --- latent modulation path (element-wise kept in f32) ---
    latent = jnp.maximum(linear(x2, wl, bl), 0.0)                 # ReLU, (Bt*S, L)
    mod_q = jax.nn.sigmoid(linear(latent, wmq, bmq))              # (Bt*S, D)
    mod_k = jax.nn.sigmoid(linear(latent, wmk, bmk))

    # --- projections (softmax scale folded into q: saves H x (Bt,S,S) VPU muls) ---
    q = linear(x2, wq, bq) * (mod_q * scale)
    k = linear(x2, wk, bk) * mod_k
    v = linear(x2, wv, bv)

    q3 = q.reshape(Bt, S, D).astype(cd)
    k3 = k.reshape(Bt, S, D).astype(cd)
    v3 = v.reshape(Bt, S, D).astype(cd)

    # --- multi-head scaled dot-product attention (mask=None path) ---
    # Static unroll over heads (H is small); the W_o projection is fused per head so no
    # per-head context slab / masked partial stores are needed.
    # TODO(synk): for H >> 8 switch to a (Bt*H, S, Dh) batched einsum or lax.fori_loop.
    attn = None
    for h in range(H):
        sl = slice(h * Dh, (h + 1) * Dh)
        qh, kh, vh = q3[:, :, sl], k3[:, :, sl], v3[:, :, sl]
        s = jnp.einsum("bqd,bkd->bqk", qh, kh,
                       preferred_element_type=jnp.float32)        # scale already in q
        s = s - jnp.max(s, axis=-1, keepdims=True)
        p = jnp.exp(s)                                            # unnormalized
        denom = jnp.sum(p, axis=-1, keepdims=True)
        if use_approx:
            inv = pl.reciprocal(denom, approx=True)               # EUP slot
        else:
            inv = 1.0 / denom                                     # exact (f32 check mode)
        ctxh = jnp.einsum("bqk,bkd->bqd", p.astype(cd), vh,
                          preferred_element_type=jnp.float32) * inv
        part = jnp.dot(ctxh.reshape(Bt * S, Dh).astype(cd), wo[sl, :],
                       preferred_element_type=jnp.float32)
        attn = part if attn is None else attn + part
    attn = attn + bo

    def layer_norm(vv, g, b):
        mu = jnp.mean(vv, axis=-1, keepdims=True)
        var = jnp.mean(jnp.square(vv - mu), axis=-1, keepdims=True)
        return (vv - mu) * jax.lax.rsqrt(var + LN_EPS) * g + b

    # --- residual + LayerNorm 1 (dropout is identity in forward/eval) ---
    h1 = layer_norm(x2 + attn, g1, be1)

    # --- feed-forward ---
    f = linear(h1, w1, b1)                                        # (Bt*S, d_ff)
    if use_approx:
        f = jax.nn.gelu(f, approximate=True)                      # tanh -> EUP (perf mode)
    else:
        f = 0.5 * f * (1.0 + jax.lax.erf(f * (1.0 / math.sqrt(2.0))))  # exact GELU
    f = linear(f, w2, b2)                                         # (Bt*S, D)

    # --- residual + LayerNorm 2 ---
    h2 = layer_norm(h1 + f, g2, be2)
    h3 = h2.reshape(Bt, S, D)

    # Carry to next layer only when there IS a next layer; store output only once.
    @pl.when(layer < last_layer)
    def _():
        act_ref[...] = h3

    @pl.when(layer == last_layer)
    def _():
        out_ref[...] = h3.astype(out_ref.dtype)


def _chip_defaults():
    """Per-generation row target / VMEM budget (safe fallbacks for unknown chips)."""
    kind = ""
    try:
        kind = jax.devices()[0].device_kind.lower()
    except Exception:
        pass
    if "v5e" in kind or "v5 lite" in kind or "v5lite" in kind:
        cfg = {"target_rows": 256, "vmem_limit": 96 << 20, "min_blocks": 1}
    elif "v6" in kind:
        cfg = {"target_rows": 768, "vmem_limit": 96 << 20, "min_blocks": 1}
    elif "v7" in kind:
        # 2 TCs share HBM: keep >=2 batch blocks so both cores are fed.
        cfg = {"target_rows": 640, "vmem_limit": 56 << 20, "min_blocks": 2}
    else:
        cfg = {"target_rows": 512, "vmem_limit": 48 << 20, "min_blocks": 1}
    try:
        cap = int(pltpu.get_tpu_info().vmem_capacity_bytes)
        cfg["vmem_limit"] = min(cfg["vmem_limit"], int(cap * 0.85))
    except Exception:
        pass
    return cfg


def _pick_batch_block(B, S, target_rows, min_blocks=1):
    """Largest divisor of B with Bt*S <= target_rows and B//Bt >= min_blocks."""
    target = max(1, target_rows // max(S, 1))
    divisors = [d for d in range(1, B + 1) if B % d == 0]
    cands = [d for d in divisors if d <= target and B // d >= min_blocks]
    return max(cands) if cands else 1


def transformer_encoder_pallas(x, layer_params_list, num_heads,
                               compute_dtype=jnp.bfloat16, batch_block=None):
    """Full TransformerEncoder forward (all layers fused) via one Pallas kernel."""
    B, S, D = x.shape
    L = len(layer_params_list)
    cfg = _chip_defaults()
    Bt = batch_block or _pick_batch_block(B, S, cfg["target_rows"], cfg["min_blocks"])
    assert B % Bt == 0
    n_blocks = B // Bt

    # Stack per-layer weights along a leading layer axis; matmul weights in compute
    # dtype (halves weight DMA bytes + doubles MXU rate in bf16 mode).
    args = []
    for name in PARAM_ORDER:
        a = jnp.stack([p[name] for p in layer_params_list], axis=0)   # (L, ...)
        if name in WEIGHT_MATS:
            a = a.astype(compute_dtype)
        args.append(a)

    weight_bytes = sum(int(a.size) * a.dtype.itemsize for a in args)
    # Keep the whole stacked weight set VMEM-resident (fetched from HBM exactly once)
    # when it comfortably fits the budget and there is more than one batch block.
    resident = (n_blocks > 1) and (2 * weight_bytes < cfg["vmem_limit"] // 3)

    if resident:
        # Constant index_map over the full (L, ...) array -> single fetch, no re-DMA.
        w_specs = [pl.BlockSpec(a.shape, lambda b, l, nd=a.ndim: (0,) * nd)
                   for a in args]
    else:
        # Per-layer slab selected by the inner ('arbitrary') grid axis.
        w_specs = [pl.BlockSpec((None,) + a.shape[1:],
                                lambda b, l, nd=a.ndim - 1: (l,) + (0,) * nd)
                   for a in args]

    in_specs = [pl.BlockSpec((Bt, S, D), lambda b, l: (b, 0, 0))] + w_specs
    out_spec = pl.BlockSpec((Bt, S, D), lambda b, l: (b, 0, 0))        # resident over l

    kernel = partial(_fused_encoder_kernel, num_heads=num_heads,
                     compute_dtype=compute_dtype, resident_weights=resident)

    return pl.pallas_call(
        kernel,
        out_shape=jax.ShapeDtypeStruct((B, S, D), x.dtype),
        grid=(n_blocks, L),                     # layer axis innermost (carried scratch)
        in_specs=in_specs,
        out_specs=out_spec,
        scratch_shapes=[pltpu.VMEM((Bt, S, D), jnp.float32)],  # activation carry
        compiler_params=pltpu.CompilerParams(
            dimension_semantics=("parallel", "arbitrary"),
            vmem_limit_bytes=cfg["vmem_limit"]),
    )(x, *args)


# ------------------------- parameter init (deterministic) -------------------------

def init_layer_params(key, d_model, latent_dim, d_ff):
    def lin(k, fan_in, fan_out):
        kw, kb = jax.random.split(k)
        scale = 1.0 / math.sqrt(fan_in)
        w = jax.random.uniform(kw, (fan_in, fan_out), jnp.float32, -scale, scale)
        b = jax.random.uniform(kb, (1, fan_out), jnp.float32, -scale, scale)
        return w, b

    keys = jax.random.split(key, 9)
    p = {}
    p["wq"], p["bq"] = lin(keys[0], d_model, d_model)
    p["wk"], p["bk"] = lin(keys[1], d_model, d_model)
    p["wv"], p["bv"] = lin(keys[2], d_model, d_model)
    p["wo"], p["bo"] = lin(keys[3], d_model, d_model)
    p["wl"], p["bl"] = lin(keys[4], d_model, latent_dim)
    p["wmq"], p["bmq"] = lin(keys[5], latent_dim, d_model)
    p["wmk"], p["bmk"] = lin(keys[6], latent_dim, d_model)
    p["w1"], p["b1"] = lin(keys[7], d_model, d_ff)
    p["w2"], p["b2"] = lin(keys[8], d_ff, d_model)
    p["g1"] = jnp.ones((1, d_model), jnp.float32)
    p["be1"] = jnp.zeros((1, d_model), jnp.float32)
    p["g2"] = jnp.ones((1, d_model), jnp.float32)
    p["be2"] = jnp.zeros((1, d_model), jnp.float32)
    return p


# ------------------------- pure-JAX reference -------------------------

def encoder_layer_ref(x, p, num_heads):
    B, S, D = x.shape
    Dh = D // num_heads

    def lin(v, w, b):
        return v @ w + b

    def layer_norm(v, g, b):
        mu = jnp.mean(v, axis=-1, keepdims=True)
        var = jnp.mean((v - mu) ** 2, axis=-1, keepdims=True)
        return (v - mu) / jnp.sqrt(var + LN_EPS) * g + b

    latent = jax.nn.relu(lin(x, p["wl"], p["bl"]))
    mq = jax.nn.sigmoid(lin(latent, p["wmq"], p["bmq"]))
    mk = jax.nn.sigmoid(lin(latent, p["wmk"], p["bmk"]))
    q = (lin(x, p["wq"], p["bq"]) * mq).reshape(B, S, num_heads, Dh).transpose(0, 2, 1, 3)
    k = (lin(x, p["wk"], p["bk"]) * mk).reshape(B, S, num_heads, Dh).transpose(0, 2, 1, 3)
    v = lin(x, p["wv"], p["bv"]).reshape(B, S, num_heads, Dh).transpose(0, 2, 1, 3)
    scores = (q @ k.transpose(0, 1, 3, 2)) / math.sqrt(Dh)
    w = jax.nn.softmax(scores, axis=-1)
    a = (w @ v).transpose(0, 2, 1, 3).reshape(B, S, D)
    a = lin(a, p["wo"], p["bo"])
    h1 = layer_norm(x + a, p["g1"], p["be1"])
    f = lin(h1, p["w1"], p["b1"])
    f = 0.5 * f * (1.0 + jax.scipy.special.erf(f / math.sqrt(2.0)))  # exact GELU
    f = lin(f, p["w2"], p["b2"])
    return layer_norm(h1 + f, p["g2"], p["be2"])


def transformer_encoder_ref(x, layer_params_list, num_heads):
    for p in layer_params_list:
        x = encoder_layer_ref(x, p, num_heads)
    return x


# ------------------------- main -------------------------

if __name__ == "__main__":
    # small, module-consistent shapes
    num_layers = 2
    B, S = 2, 8
    d_model = 32
    num_heads = 4
    latent_dim = 16
    d_ff = 512          # FeedForward default

    root = jax.random.PRNGKey(0)
    kx, kp = jax.random.split(root)
    x = jax.random.normal(kx, (B, S, d_model), jnp.float32)

    layer_keys = jax.random.split(kp, num_layers)
    layer_params = [init_layer_params(k, d_model, latent_dim, d_ff) for k in layer_keys]

    ref = transformer_encoder_ref(x, layer_params, num_heads)

    # 1) exact f32-operand path: strict correctness check vs the pure-JAX reference.
    out_f32 = transformer_encoder_pallas(x, layer_params, num_heads,
                                         compute_dtype=jnp.float32)
    out_f32 = jax.block_until_ready(out_f32)
    assert out_f32.shape == (B, S, d_model)
    assert jnp.allclose(out_f32, ref, atol=1e-4, rtol=1e-4), (
        float(jnp.max(jnp.abs(out_f32 - ref))))

    # 2) exact f32 path with >1 batch block: exercises the resident-weights spec
    #    (constant index_map, dynamic per-layer slice inside the kernel).
    out_res = transformer_encoder_pallas(x, layer_params, num_heads,
                                         compute_dtype=jnp.float32, batch_block=1)
    out_res = jax.block_until_ready(out_res)
    assert jnp.allclose(out_res, ref, atol=1e-4, rtol=1e-4), (
        float(jnp.max(jnp.abs(out_res - ref))))

    # 3) bf16 matmul-operand perf path: bf16 operand rounding (~2^-9 relative), approx
    #    reciprocal and tanh-GELU perturb results at the percent level -> loose tolerance.
    out_bf16 = transformer_encoder_pallas(x, layer_params, num_heads,
                                          compute_dtype=jnp.bfloat16)
    out_bf16 = jax.block_until_ready(out_bf16)
    assert out_bf16.shape == (B, S, d_model)
    assert jnp.allclose(out_bf16, ref, atol=1e-1, rtol=1e-1), (
        float(jnp.max(jnp.abs(out_bf16 - ref))))

    print("KERNEL_OK")
</pallas_src>

<mosaic_0001>
module attributes {stable_mosaic.version = 11 : i64} {
  func.func @_fused_encoder_kernel(%arg0: i32, %arg1: i32, %arg2: memref<2x8x32xf32, #tpu.memory_space<vmem>>, %arg3: memref<1x32x32xf32, #tpu.memory_space<vmem>>, %arg4: memref<1x1x32xf32, #tpu.memory_space<vmem>>, %arg5: memref<1x32x32xf32, #tpu.memory_space<vmem>>, %arg6: memref<1x1x32xf32, #tpu.memory_space<vmem>>, %arg7: memref<1x32x32xf32, #tpu.memory_space<vmem>>, %arg8: memref<1x1x32xf32, #tpu.memory_space<vmem>>, %arg9: memref<1x32x32xf32, #tpu.memory_space<vmem>>, %arg10: memref<1x1x32xf32, #tpu.memory_space<vmem>>, %arg11: memref<1x32x16xf32, #tpu.memory_space<vmem>>, %arg12: memref<1x1x16xf32, #tpu.memory_space<vmem>>, %arg13: memref<1x16x32xf32, #tpu.memory_space<vmem>>, %arg14: memref<1x1x32xf32, #tpu.memory_space<vmem>>, %arg15: memref<1x16x32xf32, #tpu.memory_space<vmem>>, %arg16: memref<1x1x32xf32, #tpu.memory_space<vmem>>, %arg17: memref<1x32x512xf32, #tpu.memory_space<vmem>>, %arg18: memref<1x1x512xf32, #tpu.memory_space<vmem>>, %arg19: memref<1x512x32xf32, #tpu.memory_space<vmem>>, %arg20: memref<1x1x32xf32, #tpu.memory_space<vmem>>, %arg21: memref<1x1x32xf32, #tpu.memory_space<vmem>>, %arg22: memref<1x1x32xf32, #tpu.memory_space<vmem>>, %arg23: memref<1x1x32xf32, #tpu.memory_space<vmem>>, %arg24: memref<1x1x32xf32, #tpu.memory_space<vmem>>, %arg25: memref<2x8x32xf32, #tpu.memory_space<vmem>>, %arg26: memref<2x8x32xf32, #tpu.memory_space<vmem>>) attributes {dimension_semantics = [#tpu.dimension_semantics<parallel>, #tpu.dimension_semantics<arbitrary>], iteration_bounds = array<i64: 1, 2>, scalar_prefetch = 0 : i64, scratch_operands = 1 : i64, tpu.core_type = #tpu.core_type<tc>, window_params = [{transform_indices = @transform_0, window_bounds = array<i64: 2, 8, 32>}, {transform_indices = @transform_1, window_bounds = array<i64: 1, 32, 32>}, {transform_indices = @transform_2, window_bounds = array<i64: 1, 1, 32>}, {transform_indices = @transform_3, window_bounds = array<i64: 1, 32, 32>}, {transform_indices = @transform_4, window_bounds = array<i64: 1, 1, 32>}, {transform_indices = @transform_5, window_bounds = array<i64: 1, 32, 32>}, {transform_indices = @transform_6, window_bounds = array<i64: 1, 1, 32>}, {transform_indices = @transform_7, window_bounds = array<i64: 1, 32, 32>}, {transform_indices = @transform_8, window_bounds = array<i64: 1, 1, 32>}, {transform_indices = @transform_9, window_bounds = array<i64: 1, 32, 16>}, {transform_indices = @transform_10, window_bounds = array<i64: 1, 1, 16>}, {transform_indices = @transform_11, window_bounds = array<i64: 1, 16, 32>}, {transform_indices = @transform_12, window_bounds = array<i64: 1, 1, 32>}, {transform_indices = @transform_13, window_bounds = array<i64: 1, 16, 32>}, {transform_indices = @transform_14, window_bounds = array<i64: 1, 1, 32>}, {transform_indices = @transform_15, window_bounds = array<i64: 1, 32, 512>}, {transform_indices = @transform_16, window_bounds = array<i64: 1, 1, 512>}, {transform_indices = @transform_17, window_bounds = array<i64: 1, 512, 32>}, {transform_indices = @transform_18, window_bounds = array<i64: 1, 1, 32>}, {transform_indices = @transform_19, window_bounds = array<i64: 1, 1, 32>}, {transform_indices = @transform_20, window_bounds = array<i64: 1, 1, 32>}, {transform_indices = @transform_21, window_bounds = array<i64: 1, 1, 32>}, {transform_indices = @transform_22, window_bounds = array<i64: 1, 1, 32>}, {transform_indices = @transform_23, window_bounds = array<i64: 2, 8, 32>}]} {
    %c0_i32 = arith.constant 0 : i32
    %0 = arith.cmpi eq, %arg1, %c0_i32 : i32
    %1 = arith.extui %0 : i1 to i32
    %c0_i32_0 = arith.constant 0 : i32
    %2 = arith.cmpi ne, %1, %c0_i32_0 : i32
    scf.if %2 {
      %c0_120 = arith.constant 0 : index
      %c0_121 = arith.constant 0 : index
      %c0_122 = arith.constant 0 : index
      %234 = vector.load %arg2[%c0_120, %c0_121, %c0_122] : memref<2x8x32xf32, #tpu.memory_space<vmem>>, vector<2x8x32xf32>
      %c0_123 = arith.constant 0 : index
      %c0_124 = arith.constant 0 : index
      %c0_125 = arith.constant 0 : index
      %235 = vector.load %arg26[%c0_123, %c0_124, %c0_125] : memref<2x8x32xf32, #tpu.memory_space<vmem>>, vector<2x8x32xf32>
      tpu.vector_store %arg26[%c0_123, %c0_124, %c0_125], %234 {strides = array<i32>} : memref<2x8x32xf32, #tpu.memory_space<vmem>>, vector<2x8x32xf32>,
    } else {
    }
    %c0 = arith.constant 0 : index
    %c0_1 = arith.constant 0 : index
    %c0_2 = arith.constant 0 : index
    %3 = vector.load %arg3[%c0, %c0_1, %c0_2] : memref<1x32x32xf32, #tpu.memory_space<vmem>>, vector<1x32x32xf32>
    %4 = vector.shape_cast %3 : vector<1x32x32xf32> to vector<32x32xf32>
    %c0_3 = arith.constant 0 : index
    %c0_4 = arith.constant 0 : index
    %c0_5 = arith.constant 0 : index
    %5 = vector.load %arg4[%c0_3, %c0_4, %c0_5] : memref<1x1x32xf32, #tpu.memory_space<vmem>>, vector<1x1x32xf32>
    %6 = vector.shape_cast %5 : vector<1x1x32xf32> to vector<1x32xf32>
    %c0_6 = arith.constant 0 : index
    %c0_7 = arith.constant 0 : index
    %c0_8 = arith.constant 0 : index
    %7 = vector.load %arg5[%c0_6, %c0_7, %c0_8] : memref<1x32x32xf32, #tpu.memory_space<vmem>>, vector<1x32x32xf32>
    %8 = vector.shape_cast %7 : vector<1x32x32xf32> to vector<32x32xf32>
    %c0_9 = arith.constant 0 : index
    %c0_10 = arith.constant 0 : index
    %c0_11 = arith.constant 0 : index
    %9 = vector.load %arg6[%c0_9, %c0_10, %c0_11] : memref<1x1x32xf32, #tpu.memory_space<vmem>>, vector<1x1x32xf32>
    %10 = vector.shape_cast %9 : vector<1x1x32xf32> to vector<1x32xf32>
    %c0_12 = arith.constant 0 : index
    %c0_13 = arith.constant 0 : index
    %c0_14 = arith.constant 0 : index
    %11 = vector.load %arg7[%c0_12, %c0_13, %c0_14] : memref<1x32x32xf32, #tpu.memory_space<vmem>>, vector<1x32x32xf32>
    %12 = vector.shape_cast %11 : vector<1x32x32xf32> to vector<32x32xf32>
    %c0_15 = arith.constant 0 : index
    %c0_16 = arith.constant 0 : index
    %c0_17 = arith.constant 0 : index
    %13 = vector.load %arg8[%c0_15, %c0_16, %c0_17] : memref<1x1x32xf32, #tpu.memory_space<vmem>>, vector<1x1x32xf32>
    %14 = vector.shape_cast %13 : vector<1x1x32xf32> to vector<1x32xf32>
    %c0_18 = arith.constant 0 : index
    %c0_19 = arith.constant 0 : index
    %c0_20 = arith.constant 0 : index
    %15 = vector.load %arg9[%c0_18, %c0_19, %c0_20] : memref<1x32x32xf32, #tpu.memory_space<vmem>>, vector<1x32x32xf32>
    %16 = vector.shape_cast %15 : vector<1x32x32xf32> to vector<32x32xf32>
    %c0_21 = arith.constant 0 : index
    %c0_22 = arith.constant 0 : index
    %c0_23 = arith.constant 0 : index
    %17 = vector.load %arg10[%c0_21, %c0_22, %c0_23] : memref<1x1x32xf32, #tpu.memory_space<vmem>>, vector<1x1x32xf32>
    %18 = vector.shape_cast %17 : vector<1x1x32xf32> to vector<1x32xf32>
    %c0_24 = arith.constant 0 : index
    %c0_25 = arith.constant 0 : index
    %c0_26 = arith.constant 0 : index
    %19 = vector.load %arg11[%c0_24, %c0_25, %c0_26] : memref<1x32x16xf32, #tpu.memory_space<vmem>>, vector<1x32x16xf32>
    %20 = vector.shape_cast %19 : vector<1x32x16xf32> to vector<32x16xf32>
    %c0_27 = arith.constant 0 : index
    %c0_28 = arith.constant 0 : index
    %c0_29 = arith.constant 0 : index
    %21 = vector.load %arg12[%c0_27, %c0_28, %c0_29] : memref<1x1x16xf32, #tpu.memory_space<vmem>>, vector<1x1x16xf32>
    %22 = vector.shape_cast %21 : vector<1x1x16xf32> to vector<1x16xf32>
    %c0_30 = arith.constant 0 : index
    %c0_31 = arith.constant 0 : index
    %c0_32 = arith.constant 0 : index
    %23 = vector.load %arg13[%c0_30, %c0_31, %c0_32] : memref<1x16x32xf32, #tpu.memory_space<vmem>>, vector<1x16x32xf32>
    %24 = vector.shape_cast %23 : vector<1x16x32xf32> to vector<16x32xf32>
    %c0_33 = arith.constant 0 : index
    %c0_34 = arith.constant 0 : index
    %c0_35 = arith.constant 0 : index
    %25 = vector.load %arg14[%c0_33, %c0_34, %c0_35] : memref<1x1x32xf32, #tpu.memory_space<vmem>>, vector<1x1x32xf32>
    %26 = vector.shape_cast %25 : vector<1x1x32xf32> to vector<1x32xf32>
    %c0_36 = arith.constant 0 : index
    %c0_37 = arith.constant 0 : index
    %c0_38 = arith.constant 0 : index
    %27 = vector.load %arg15[%c0_36, %c0_37, %c0_38] : memref<1x16x32xf32, #tpu.memory_space<vmem>>, vector<1x16x32xf32>
    %28 = vector.shape_cast %27 : vector<1x16x32xf32> to vector<16x32xf32>
    %c0_39 = arith.constant 0 : index
    %c0_40 = arith.constant 0 : index
    %c0_41 = arith.constant 0 : index
    %29 = vector.load %arg16[%c0_39, %c0_40, %c0_41] : memref<1x1x32xf32, #tpu.memory_space<vmem>>, vector<1x1x32xf32>
    %30 = vector.shape_cast %29 : vector<1x1x32xf32> to vector<1x32xf32>
    %c0_42 = arith.constant 0 : index
    %c0_43 = arith.constant 0 : index
    %c0_44 = arith.constant 0 : index
    %31 = vector.load %arg17[%c0_42, %c0_43, %c0_44] : memref<1x32x512xf32, #tpu.memory_space<vmem>>, vector<1x32x512xf32>
    %32 = vector.shape_cast %31 : vector<1x32x512xf32> to vector<32x512xf32>
    %c0_45 = arith.constant 0 : index
    %c0_46 = arith.constant 0 : index
    %c0_47 = arith.constant 0 : index
    %33 = vector.load %arg18[%c0_45, %c0_46, %c0_47] : memref<1x1x512xf32, #tpu.memory_space<vmem>>, vector<1x1x512xf32>
    %34 = vector.shape_cast %33 : vector<1x1x512xf32> to vector<1x512xf32>
    %c0_48 = arith.constant 0 : index
    %c0_49 = arith.constant 0 : index
    %c0_50 = arith.constant 0 : index
    %35 = vector.load %arg19[%c0_48, %c0_49, %c0_50] : memref<1x512x32xf32, #tpu.memory_space<vmem>>, vector<1x512x32xf32>
    %36 = vector.shape_cast %35 : vector<1x512x32xf32> to vector<512x32xf32>
    %c0_51 = arith.constant 0 : index
    %c0_52 = arith.constant 0 : index
    %c0_53 = arith.constant 0 : index
    %37 = vector.load %arg20[%c0_51, %c0_52, %c0_53] : memref<1x1x32xf32, #tpu.memory_space<vmem>>, vector<1x1x32xf32>
    %38 = vector.shape_cast %37 : vector<1x1x32xf32> to vector<1x32xf32>
    %c0_54 = arith.constant 0 : index
    %c0_55 = arith.constant 0 : index
    %c0_56 = arith.constant 0 : index
    %39 = vector.load %arg21[%c0_54, %c0_55, %c0_56] : memref<1x1x32xf32, #tpu.memory_space<vmem>>, vector<1x1x32xf32>
    %40 = vector.shape_cast %39 : vector<1x1x32xf32> to vector<1x32xf32>
    %c0_57 = arith.constant 0 : index
    %c0_58 = arith.constant 0 : index
    %c0_59 = arith.constant 0 : index
    %41 = vector.load %arg22[%c0_57, %c0_58, %c0_59] : memref<1x1x32xf32, #tpu.memory_space<vmem>>, vector<1x1x32xf32>
    %42 = vector.shape_cast %41 : vector<1x1x32xf32> to vector<1x32xf32>
    %c0_60 = arith.constant 0 : index
    %c0_61 = arith.constant 0 : index
    %c0_62 = arith.constant 0 : index
    %43 = vector.load %arg23[%c0_60, %c0_61, %c0_62] : memref<1x1x32xf32, #tpu.memory_space<vmem>>, vector<1x1x32xf32>
    %44 = vector.shape_cast %43 : vector<1x1x32xf32> to vector<1x32xf32>
    %c0_63 = arith.constant 0 : index
    %c0_64 = arith.constant 0 : index
    %c0_65 = arith.constant 0 : index
    %45 = vector.load %arg24[%c0_63, %c0_64, %c0_65] : memref<1x1x32xf32, #tpu.memory_space<vmem>>, vector<1x1x32xf32>
    %46 = vector.shape_cast %45 : vector<1x1x32xf32> to vector<1x32xf32>
    %c0_66 = arith.constant 0 : index
    %c0_67 = arith.constant 0 : index
    %c0_68 = arith.constant 0 : index
    %47 = vector.load %arg26[%c0_66, %c0_67, %c0_68] : memref<2x8x32xf32, #tpu.memory_space<vmem>>, vector<2x8x32xf32>
    %48 = vector.shape_cast %47 : vector<2x8x32xf32> to vector<16x32xf32>
    %cst = arith.constant dense<0.000000e+00> : vector<16x16xf32>
    %49 = tpu.matmul %48, %20, %cst {dimension_numbers = #tpu.dot_dimension_numbers<[1], [0], [0], [1], [0, 0, 1, 1], [], []>} : vector<16x32xf32>, vector<32x16xf32>, vector<16x16xf32> -> vector<16x16xf32>
    %50 = vector.broadcast %22 : vector<1x16xf32> to vector<16x16xf32>
    %51 = arith.addf %49, %50 : vector<16x16xf32>
    %cst_69 = arith.constant 0.000000e+00 : f32
    %52 = vector.broadcast %cst_69 : f32 to vector<16x16xf32>
    %53 = arith.maximumf %51, %52 : vector<16x16xf32>
    %cst_70 = arith.constant dense<0.000000e+00> : vector<16x32xf32>
    %54 = tpu.matmul %53, %24, %cst_70 {dimension_numbers = #tpu.dot_dimension_numbers<[1], [0], [0], [1], [0, 0, 1, 1], [], []>} : vector<16x16xf32>, vector<16x32xf32>, vector<16x32xf32> -> vector<16x32xf32>
    %55 = vector.broadcast %26 : vector<1x32xf32> to vector<16x32xf32>
    %56 = arith.addf %54, %55 : vector<16x32xf32>
    %57 = arith.negf %56 : vector<16x32xf32>
    %58 = math.exp %57 : vector<16x32xf32>
    %cst_71 = arith.constant 1.000000e+00 : f32
    %59 = vector.broadcast %cst_71 : f32 to vector<16x32xf32>
    %60 = arith.addf %59, %58 : vector<16x32xf32>
    %61 = arith.divf %59, %60 : vector<16x32xf32>
    %cst_72 = arith.constant dense<0.000000e+00> : vector<16x32xf32>
    %62 = tpu.matmul %53, %28, %cst_72 {dimension_numbers = #tpu.dot_dimension_numbers<[1], [0], [0], [1], [0, 0, 1, 1], [], []>} : vector<16x16xf32>, vector<16x32xf32>, vector<16x32xf32> -> vector<16x32xf32>
    %63 = vector.broadcast %30 : vector<1x32xf32> to vector<16x32xf32>
    %64 = arith.addf %62, %63 : vector<16x32xf32>
    %65 = arith.negf %64 : vector<16x32xf32>
    %66 = math.exp %65 : vector<16x32xf32>
    %cst_73 = arith.constant 1.000000e+00 : f32
    %67 = vector.broadcast %cst_73 : f32 to vector<16x32xf32>
    %68 = arith.addf %67, %66 : vector<16x32xf32>
    %69 = arith.divf %67, %68 : vector<16x32xf32>
    %cst_74 = arith.constant dense<0.000000e+00> : vector<16x32xf32>
    %70 = tpu.matmul %48, %4, %cst_74 {dimension_numbers = #tpu.dot_dimension_numbers<[1], [0], [0], [1], [0, 0, 1, 1], [], []>} : vector<16x32xf32>, vector<32x32xf32>, vector<16x32xf32> -> vector<16x32xf32>
    %71 = vector.broadcast %6 : vector<1x32xf32> to vector<16x32xf32>
    %72 = arith.addf %70, %71 : vector<16x32xf32>
    %cst_75 = arith.constant 0.353553385 : f32
    %73 = vector.broadcast %cst_75 : f32 to vector<16x32xf32>
    %74 = arith.mulf %61, %73 : vector<16x32xf32>
    %75 = arith.mulf %72, %74 : vector<16x32xf32>
    %cst_76 = arith.constant dense<0.000000e+00> : vector<16x32xf32>
    %76 = tpu.matmul %48, %8, %cst_76 {dimension_numbers = #tpu.dot_dimension_numbers<[1], [0], [0], [1], [0, 0, 1, 1], [], []>} : vector<16x32xf32>, vector<32x32xf32>, vector<16x32xf32> -> vector<16x32xf32>
    %77 = vector.broadcast %10 : vector<1x32xf32> to vector<16x32xf32>
    %78 = arith.addf %76, %77 : vector<16x32xf32>
    %79 = arith.mulf %78, %69 : vector<16x32xf32>
    %cst_77 = arith.constant dense<0.000000e+00> : vector<16x32xf32>
    %80 = tpu.matmul %48, %12, %cst_77 {dimension_numbers = #tpu.dot_dimension_numbers<[1], [0], [0], [1], [0, 0, 1, 1], [], []>} : vector<16x32xf32>, vector<32x32xf32>, vector<16x32xf32> -> vector<16x32xf32>
    %81 = vector.broadcast %14 : vector<1x32xf32> to vector<16x32xf32>
    %82 = arith.addf %80, %81 : vector<16x32xf32>
    %83 = vector.shape_cast %75 : vector<16x32xf32> to vector<2x8x32xf32>
    %84 = vector.shape_cast %79 : vector<16x32xf32> to vector<2x8x32xf32>
    %85 = vector.shape_cast %82 : vector<16x32xf32> to vector<2x8x32xf32>
    %86 = vector.extract_strided_slice %83 {offsets = [0, 0, 0], sizes = [2, 8, 8], strides = [1, 1, 1]} : vector<2x8x32xf32> to vector<2x8x8xf32>
    %87 = vector.extract_strided_slice %84 {offsets = [0, 0, 0], sizes = [2, 8, 8], strides = [1, 1, 1]} : vector<2x8x32xf32> to vector<2x8x8xf32>
    %88 = vector.extract_strided_slice %85 {offsets = [0, 0, 0], sizes = [2, 8, 8], strides = [1, 1, 1]} : vector<2x8x32xf32> to vector<2x8x8xf32>
    "tpu.trace_start"() <{level = 10 : i32, message = "bqd,bkd->bqk"}> : () -> ()
    %cst_78 = arith.constant dense<0.000000e+00> : vector<2x8x8xf32>
    %89 = tpu.matmul %86, %87, %cst_78 {dimension_numbers = #tpu.dot_dimension_numbers<[2], [2], [1], [1], [0, 0, 0, 1, 1, 1], [0], [0]>} : vector<2x8x8xf32>, vector<2x8x8xf32>, vector<2x8x8xf32> -> vector<2x8x8xf32>
    "tpu.trace_stop"() : () -> ()
    %cst_79 = arith.constant dense<0xFF800000> : vector<2x8xf32>
    %90 = vector.multi_reduction <maximumf>, %89, %cst_79 [2] : vector<2x8x8xf32> to vector<2x8xf32>
    %91 = vector.shape_cast %90 : vector<2x8xf32> to vector<2x8x1xf32>
    %92 = vector.broadcast %91 : vector<2x8x1xf32> to vector<2x8x8xf32>
    %93 = arith.subf %89, %92 : vector<2x8x8xf32>
    %94 = math.exp %93 : vector<2x8x8xf32>
    %cst_80 = arith.constant dense<0.000000e+00> : vector<2x8xf32>
    %95 = vector.multi_reduction <add>, %94, %cst_80 [2] : vector<2x8x8xf32> to vector<2x8xf32>
    %96 = vector.shape_cast %95 : vector<2x8xf32> to vector<2x8x1xf32>
    %cst_81 = arith.constant 1.000000e+00 : f32
    %97 = vector.broadcast %cst_81 : f32 to vector<2x8x1xf32>
    %98 = arith.divf %97, %96 : vector<2x8x1xf32>
    "tpu.trace_start"() <{level = 10 : i32, message = "bqk,bkd->bqd"}> : () -> ()
    %cst_82 = arith.constant dense<0.000000e+00> : vector<2x8x8xf32>
    %99 = tpu.matmul %94, %88, %cst_82 {dimension_numbers = #tpu.dot_dimension_numbers<[2], [1], [1], [2], [0, 0, 0, 1, 1, 2], [0], [0]>} : vector<2x8x8xf32>, vector<2x8x8xf32>, vector<2x8x8xf32> -> vector<2x8x8xf32>
    "tpu.trace_stop"() : () -> ()
    %100 = vector.broadcast %98 : vector<2x8x1xf32> to vector<2x8x8xf32>
    %101 = arith.mulf %99, %100 : vector<2x8x8xf32>
    %102 = vector.shape_cast %101 : vector<2x8x8xf32> to vector<16x8xf32>
    %103 = vector.extract_strided_slice %16 {offsets = [0, 0], sizes = [8, 32], strides = [1, 1]} : vector<32x32xf32> to vector<8x32xf32>
    %cst_83 = arith.constant dense<0.000000e+00> : vector<16x32xf32>
    %104 = tpu.matmul %102, %103, %cst_83 {dimension_numbers = #tpu.dot_dimension_numbers<[1], [0], [0], [1], [0, 0, 1, 1], [], []>} : vector<16x8xf32>, vector<8x32xf32>, vector<16x32xf32> -> vector<16x32xf32>
    %105 = vector.extract_strided_slice %83 {offsets = [0, 0, 8], sizes = [2, 8, 8], strides = [1, 1, 1]} : vector<2x8x32xf32> to vector<2x8x8xf32>
    %106 = vector.extract_strided_slice %84 {offsets = [0, 0, 8], sizes = [2, 8, 8], strides = [1, 1, 1]} : vector<2x8x32xf32> to vector<2x8x8xf32>
    %107 = vector.extract_strided_slice %85 {offsets = [0, 0, 8], sizes = [2, 8, 8], strides = [1, 1, 1]} : vector<2x8x32xf32> to vector<2x8x8xf32>
    "tpu.trace_start"() <{level = 10 : i32, message = "bqd,bkd->bqk"}> : () -> ()
    %cst_84 = arith.constant dense<0.000000e+00> : vector<2x8x8xf32>
    %108 = tpu.matmul %105, %106, %cst_84 {dimension_numbers = #tpu.dot_dimension_numbers<[2], [2], [1], [1], [0, 0, 0, 1, 1, 1], [0], [0]>} : vector<2x8x8xf32>, vector<2x8x8xf32>, vector<2x8x8xf32> -> vector<2x8x8xf32>
    "tpu.trace_stop"() : () -> ()
    %cst_85 = arith.constant dense<0xFF800000> : vector<2x8xf32>
    %109 = vector.multi_reduction <maximumf>, %108, %cst_85 [2] : vector<2x8x8xf32> to vector<2x8xf32>
    %110 = vector.shape_cast %109 : vector<2x8xf32> to vector<2x8x1xf32>
    %111 = vector.broadcast %110 : vector<2x8x1xf32> to vector<2x8x8xf32>
    %112 = arith.subf %108, %111 : vector<2x8x8xf32>
    %113 = math.exp %112 : vector<2x8x8xf32>
    %cst_86 = arith.constant dense<0.000000e+00> : vector<2x8xf32>
    %114 = vector.multi_reduction <add>, %113, %cst_86 [2] : vector<2x8x8xf32> to vector<2x8xf32>
    %115 = vector.shape_cast %114 : vector<2x8xf32> to vector<2x8x1xf32>
    %cst_87 = arith.constant 1.000000e+00 : f32
    %116 = vector.broadcast %cst_87 : f32 to vector<2x8x1xf32>
    %117 = arith.divf %116, %115 : vector<2x8x1xf32>
    "tpu.trace_start"() <{level = 10 : i32, message = "bqk,bkd->bqd"}> : () -> ()
    %cst_88 = arith.constant dense<0.000000e+00> : vector<2x8x8xf32>
    %118 = tpu.matmul %113, %107, %cst_88 {dimension_numbers = #tpu.dot_dimension_numbers<[2], [1], [1], [2], [0, 0, 0, 1, 1, 2], [0], [0]>} : vector<2x8x8xf32>, vector<2x8x8xf32>, vector<2x8x8xf32> -> vector<2x8x8xf32>
    "tpu.trace_stop"() : () -> ()
    %119 = vector.broadcast %117 : vector<2x8x1xf32> to vector<2x8x8xf32>
    %120 = arith.mulf %118, %119 : vector<2x8x8xf32>
    %121 = vector.shape_cast %120 : vector<2x8x8xf32> to vector<16x8xf32>
    %122 = vector.extract_strided_slice %16 {offsets = [8, 0], sizes = [8, 32], strides = [1, 1]} : vector<32x32xf32> to vector<8x32xf32>
    %cst_89 = arith.constant dense<0.000000e+00> : vector<16x32xf32>
    %123 = tpu.matmul %121, %122, %cst_89 {dimension_numbers = #tpu.dot_dimension_numbers<[1], [0], [0], [1], [0, 0, 1, 1], [], []>} : vector<16x8xf32>, vector<8x32xf32>, vector<16x32xf32> -> vector<16x32xf32>
    %124 = arith.addf %104, %123 : vector<16x32xf32>
    %125 = vector.extract_strided_slice %83 {offsets = [0, 0, 16], sizes = [2, 8, 8], strides = [1, 1, 1]} : vector<2x8x32xf32> to vector<2x8x8xf32>
    %126 = vector.extract_strided_slice %84 {offsets = [0, 0, 16], sizes = [2, 8, 8], strides = [1, 1, 1]} : vector<2x8x32xf32> to vector<2x8x8xf32>
    %127 = vector.extract_strided_slice %85 {offsets = [0, 0, 16], sizes = [2, 8, 8], strides = [1, 1, 1]} : vector<2x8x32xf32> to vector<2x8x8xf32>
    "tpu.trace_start"() <{level = 10 : i32, message = "bqd,bkd->bqk"}> : () -> ()
    %cst_90 = arith.constant dense<0.000000e+00> : vector<2x8x8xf32>
    %128 = tpu.matmul %125, %126, %cst_90 {dimension_numbers = #tpu.dot_dimension_numbers<[2], [2], [1], [1], [0, 0, 0, 1, 1, 1], [0], [0]>} : vector<2x8x8xf32>, vector<2x8x8xf32>, vector<2x8x8xf32> -> vector<2x8x8xf32>
    "tpu.trace_stop"() : () -> ()
    %cst_91 = arith.constant dense<0xFF800000> : vector<2x8xf32>
    %129 = vector.multi_reduction <maximumf>, %128, %cst_91 [2] : vector<2x8x8xf32> to vector<2x8xf32>
    %130 = vector.shape_cast %129 : vector<2x8xf32> to vector<2x8x1xf32>
    %131 = vector.broadcast %130 : vector<2x8x1xf32> to vector<2x8x8xf32>
    %132 = arith.subf %128, %131 : vector<2x8x8xf32>
    %133 = math.exp %132 : vector<2x8x8xf32>
    %cst_92 = arith.constant dense<0.000000e+00> : vector<2x8xf32>
    %134 = vector.multi_reduction <add>, %133, %cst_92 [2] : vector<2x8x8xf32> to vector<2x8xf32>
    %135 = vector.shape_cast %134 : vector<2x8xf32> to vector<2x8x1xf32>
    %cst_93 = arith.constant 1.000000e+00 : f32
    %136 = vector.broadcast %cst_93 : f32 to vector<2x8x1xf32>
    %137 = arith.divf %136, %135 : vector<2x8x1xf32>
    "tpu.trace_start"() <{level = 10 : i32, message = "bqk,bkd->bqd"}> : () -> ()
    %cst_94 = arith.constant dense<0.000000e+00> : vector<2x8x8xf32>
    %138 = tpu.matmul %133, %127, %cst_94 {dimension_numbers = #tpu.dot_dimension_numbers<[2], [1], [1], [2], [0, 0, 0, 1, 1, 2], [0], [0]>} : vector<2x8x8xf32>, vector<2x8x8xf32>, vector<2x8x8xf32> -> vector<2x8x8xf32>
    "tpu.trace_stop"() : () -> ()
    %139 = vector.broadcast %137 : vector<2x8x1xf32> to vector<2x8x8xf32>
    %140 = arith.mulf %138, %139 : vector<2x8x8xf32>
    %141 = vector.shape_cast %140 : vector<2x8x8xf32> to vector<16x8xf32>
    %142 = vector.extract_strided_slice %16 {offsets = [16, 0], sizes = [8, 32], strides = [1, 1]} : vector<32x32xf32> to vector<8x32xf32>
    %cst_95 = arith.constant dense<0.000000e+00> : vector<16x32xf32>
    %143 = tpu.matmul %141, %142, %cst_95 {dimension_numbers = #tpu.dot_dimension_numbers<[1], [0], [0], [1], [0, 0, 1, 1], [], []>} : vector<16x8xf32>, vector<8x32xf32>, vector<16x32xf32> -> vector<16x32xf32>
    %144 = arith.addf %124, %143 : vector<16x32xf32>
    %145 = vector.extract_strided_slice %83 {offsets = [0, 0, 24], sizes = [2, 8, 8], strides = [1, 1, 1]} : vector<2x8x32xf32> to vector<2x8x8xf32>
    %146 = vector.extract_strided_slice %84 {offsets = [0, 0, 24], sizes = [2, 8, 8], strides = [1, 1, 1]} : vector<2x8x32xf32> to vector<2x8x8xf32>
    %147 = vector.extract_strided_slice %85 {offsets = [0, 0, 24], sizes = [2, 8, 8], strides = [1, 1, 1]} : vector<2x8x32xf32> to vector<2x8x8xf32>
    "tpu.trace_start"() <{level = 10 : i32, message = "bqd,bkd->bqk"}> : () -> ()
    %cst_96 = arith.constant dense<0.000000e+00> : vector<2x8x8xf32>
    %148 = tpu.matmul %145, %146, %cst_96 {dimension_numbers = #tpu.dot_dimension_numbers<[2], [2], [1], [1], [0, 0, 0, 1, 1, 1], [0], [0]>} : vector<2x8x8xf32>, vector<2x8x8xf32>, vector<2x8x8xf32> -> vector<2x8x8xf32>
    "tpu.trace_stop"() : () -> ()
    %cst_97 = arith.constant dense<0xFF800000> : vector<2x8xf32>
    %149 = vector.multi_reduction <maximumf>, %148, %cst_97 [2] : vector<2x8x8xf32> to vector<2x8xf32>
    %150 = vector.shape_cast %149 : vector<2x8xf32> to vector<2x8x1xf32>
    %151 = vector.broadcast %150 : vector<2x8x1xf32> to vector<2x8x8xf32>
    %152 = arith.subf %148, %151 : vector<2x8x8xf32>
    %153 = math.exp %152 : vector<2x8x8xf32>
    %cst_98 = arith.constant dense<0.000000e+00> : vector<2x8xf32>
    %154 = vector.multi_reduction <add>, %153, %cst_98 [2] : vector<2x8x8xf32> to vector<2x8xf32>
    %155 = vector.shape_cast %154 : vector<2x8xf32> to vector<2x8x1xf32>
    %cst_99 = arith.constant 1.000000e+00 : f32
    %156 = vector.broadcast %cst_99 : f32 to vector<2x8x1xf32>
    %157 = arith.divf %156, %155 : vector<2x8x1xf32>
    "tpu.trace_start"() <{level = 10 : i32, message = "bqk,bkd->bqd"}> : () -> ()
    %cst_100 = arith.constant dense<0.000000e+00> : vector<2x8x8xf32>
    %158 = tpu.matmul %153, %147, %cst_100 {dimension_numbers = #tpu.dot_dimension_numbers<[2], [1], [1], [2], [0, 0, 0, 1, 1, 2], [0], [0]>} : vector<2x8x8xf32>, vector<2x8x8xf32>, vector<2x8x8xf32> -> vector<2x8x8xf32>
    "tpu.trace_stop"() : () -> ()
    %159 = vector.broadcast %157 : vector<2x8x1xf32> to vector<2x8x8xf32>
    %160 = arith.mulf %158, %159 : vector<2x8x8xf32>
    %161 = vector.shape_cast %160 : vector<2x8x8xf32> to vector<16x8xf32>
    %162 = vector.extract_strided_slice %16 {offsets = [24, 0], sizes = [8, 32], strides = [1, 1]} : vector<32x32xf32> to vector<8x32xf32>
    %cst_101 = arith.constant dense<0.000000e+00> : vector<16x32xf32>
    %163 = tpu.matmul %161, %162, %cst_101 {dimension_numbers = #tpu.dot_dimension_numbers<[1], [0], [0], [1], [0, 0, 1, 1], [], []>} : vector<16x8xf32>, vector<8x32xf32>, vector<16x32xf32> -> vector<16x32xf32>
    %164 = arith.addf %144, %163 : vector<16x32xf32>
    %165 = vector.broadcast %18 : vector<1x32xf32> to vector<16x32xf32>
    %166 = arith.addf %164, %165 : vector<16x32xf32>
    %167 = arith.addf %48, %166 : vector<16x32xf32>
    %cst_102 = arith.constant dense<0.000000e+00> : vector<16xf32>
    %168 = vector.multi_reduction <add>, %167, %cst_102 [1] : vector<16x32xf32> to vector<16xf32>
    %169 = vector.shape_cast %168 : vector<16xf32> to vector<16x1xf32>
    %cst_103 = arith.constant 3.200000e+01 : f32
    %170 = vector.broadcast %cst_103 : f32 to vector<16x1xf32>
    %171 = arith.divf %169, %170 : vector<16x1xf32>
    %172 = vector.broadcast %171 : vector<16x1xf32> to vector<16x32xf32>
    %173 = arith.subf %167, %172 : vector<16x32xf32>
    %174 = arith.mulf %173, %173 : vector<16x32xf32>
    %cst_104 = arith.constant dense<0.000000e+00> : vector<16xf32>
    %175 = vector.multi_reduction <add>, %174, %cst_104 [1] : vector<16x32xf32> to vector<16xf32>
    %176 = vector.shape_cast %175 : vector<16xf32> to vector<16x1xf32>
    %cst_105 = arith.constant 3.200000e+01 : f32
    %177 = vector.broadcast %cst_105 : f32 to vector<16x1xf32>
    %178 = arith.divf %176, %177 : vector<16x1xf32>
    %179 = vector.broadcast %171 : vector<16x1xf32> to vector<16x32xf32>
    %180 = arith.subf %167, %179 : vector<16x32xf32>
    %cst_106 = arith.constant 9.99999974E-6 : f32
    %181 = vector.broadcast %cst_106 : f32 to vector<16x1xf32>
    %182 = arith.addf %178, %181 : vector<16x1xf32>
    %183 = math.rsqrt %182 : vector<16x1xf32>
    %184 = vector.broadcast %183 : vector<16x1xf32> to vector<16x32xf32>
    %185 = arith.mulf %180, %184 : vector<16x32xf32>
    %186 = vector.broadcast %40 : vector<1x32xf32> to vector<16x32xf32>
    %187 = arith.mulf %185, %186 : vector<16x32xf32>
    %188 = vector.broadcast %42 : vector<1x32xf32> to vector<16x32xf32>
    %189 = arith.addf %187, %188 : vector<16x32xf32>
    %cst_107 = arith.constant dense<0.000000e+00> : vector<16x512xf32>
    %190 = tpu.matmul %189, %32, %cst_107 {dimension_numbers = #tpu.dot_dimension_numbers<[1], [0], [0], [1], [0, 0, 1, 1], [], []>} : vector<16x32xf32>, vector<32x512xf32>, vector<16x512xf32> -> vector<16x512xf32>
    %191 = vector.broadcast %34 : vector<1x512xf32> to vector<16x512xf32>
    %192 = arith.addf %190, %191 : vector<16x512xf32>
    %cst_108 = arith.constant 5.000000e-01 : f32
    %193 = vector.broadcast %cst_108 : f32 to vector<16x512xf32>
    %194 = arith.mulf %193, %192 : vector<16x512xf32>
    %cst_109 = arith.constant 0.707106769 : f32
    %195 = vector.broadcast %cst_109 : f32 to vector<16x512xf32>
    %196 = arith.mulf %192, %195 : vector<16x512xf32>
    %197 = math.erf %196 : vector<16x512xf32>
    %cst_110 = arith.constant 1.000000e+00 : f32
    %198 = vector.broadcast %cst_110 : f32 to vector<16x512xf32>
    %199 = arith.addf %198, %197 : vector<16x512xf32>
    %200 = arith.mulf %194, %199 : vector<16x512xf32>
    %cst_111 = arith.constant dense<0.000000e+00> : vector<16x32xf32>
    %201 = tpu.matmul %200, %36, %cst_111 {dimension_numbers = #tpu.dot_dimension_numbers<[1], [0], [0], [1], [0, 0, 1, 1], [], []>} : vector<16x512xf32>, vector<512x32xf32>, vector<16x32xf32> -> vector<16x32xf32>
    %202 = vector.broadcast %38 : vector<1x32xf32> to vector<16x32xf32>
    %203 = arith.addf %201, %202 : vector<16x32xf32>
    %204 = arith.addf %189, %203 : vector<16x32xf32>
    %cst_112 = arith.constant dense<0.000000e+00> : vector<16xf32>
    %205 = vector.multi_reduction <add>, %204, %cst_112 [1] : vector<16x32xf32> to vector<16xf32>
    %206 = vector.shape_cast %205 : vector<16xf32> to vector<16x1xf32>
    %cst_113 = arith.constant 3.200000e+01 : f32
    %207 = vector.broadcast %cst_113 : f32 to vector<16x1xf32>
    %208 = arith.divf %206, %207 : vector<16x1xf32>
    %209 = vector.broadcast %208 : vector<16x1xf32> to vector<16x32xf32>
    %210 = arith.subf %204, %209 : vector<16x32xf32>
    %211 = arith.mulf %210, %210 : vector<16x32xf32>
    %cst_114 = arith.constant dense<0.000000e+00> : vector<16xf32>
    %212 = vector.multi_reduction <add>, %211, %cst_114 [1] : vector<16x32xf32> to vector<16xf32>
    %213 = vector.shape_cast %212 : vector<16xf32> to vector<16x1xf32>
    %cst_115 = arith.constant 3.200000e+01 : f32
    %214 = vector.broadcast %cst_115 : f32 to vector<16x1xf32>
    %215 = arith.divf %213, %214 : vector<16x1xf32>
    %216 = vector.broadcast %208 : vector<16x1xf32> to vector<16x32xf32>
    %217 = arith.subf %204, %216 : vector<16x32xf32>
    %cst_116 = arith.constant 9.99999974E-6 : f32
    %218 = vector.broadcast %cst_116 : f32 to vector<16x1xf32>
    %219 = arith.addf %215, %218 : vector<16x1xf32>
    %220 = math.rsqrt %219 : vector<16x1xf32>
    %221 = vector.broadcast %220 : vector<16x1xf32> to vector<16x32xf32>
    %222 = arith.mulf %217, %221 : vector<16x32xf32>
    %223 = vector.broadcast %44 : vector<1x32xf32> to vector<16x32xf32>
    %224 = arith.mulf %222, %223 : vector<16x32xf32>
    %225 = vector.broadcast %46 : vector<1x32xf32> to vector<16x32xf32>
    %226 = arith.addf %224, %225 : vector<16x32xf32>
    %227 = vector.shape_cast %226 : vector<16x32xf32> to vector<2x8x32xf32>
    %c1_i32 = arith.constant 1 : i32
    %228 = arith.cmpi slt, %arg1, %c1_i32 : i32
    %229 = arith.extui %228 : i1 to i32
    %c0_i32_117 = arith.constant 0 : i32
    %230 = arith.cmpi ne, %229, %c0_i32_117 : i32
    scf.if %230 {
      %c0_120 = arith.constant 0 : index
      %c0_121 = arith.constant 0 : index
      %c0_122 = arith.constant 0 : index
      %234 = vector.load %arg26[%c0_120, %c0_121, %c0_122] : memref<2x8x32xf32, #tpu.memory_space<vmem>>, vector<2x8x32xf32>
      tpu.vector_store %arg26[%c0_120, %c0_121, %c0_122], %227 {strides = array<i32>} : memref<2x8x32xf32, #tpu.memory_space<vmem>>, vector<2x8x32xf32>,
    } else {
    }
    %c1_i32_118 = arith.constant 1 : i32
    %231 = arith.cmpi eq, %arg1, %c1_i32_118 : i32
    %232 = arith.extui %231 : i1 to i32
    %c0_i32_119 = arith.constant 0 : i32
    %233 = arith.cmpi ne, %232, %c0_i32_119 : i32
    scf.if %233 {
      %c0_120 = arith.constant 0 : index
      %c0_121 = arith.constant 0 : index
      %c0_122 = arith.constant 0 : index
      %234 = vector.load %arg25[%c0_120, %c0_121, %c0_122] : memref<2x8x32xf32, #tpu.memory_space<vmem>>, vector<2x8x32xf32>
      tpu.vector_store %arg25[%c0_120, %c0_121, %c0_122], %227 {strides = array<i32>} : memref<2x8x32xf32, #tpu.memory_space<vmem>>, vector<2x8x32xf32>,
    } else {
    }
    return
  }
  func.func @transform_0(%arg0: i32, %arg1: i32) -> (i32, i32, i32) {
    %c0_i32 = arith.constant 0 : i32
    %c0_i32_0 = arith.constant 0 : i32
    %c0_i32_1 = arith.constant 0 : i32
    return %arg0, %c0_i32, %c0_i32_0 : i32, i32, i32
  }
  func.func @transform_1(%arg0: i32, %arg1: i32) -> (i32, i32, i32) {
    %c0_i32 = arith.constant 0 : i32
    %c0_i32_0 = arith.constant 0 : i32
    %c0_i32_1 = arith.constant 0 : i32
    return %arg1, %c0_i32, %c0_i32_0 : i32, i32, i32
  }
  func.func @transform_2(%arg0: i32, %arg1: i32) -> (i32, i32, i32) {
    %c0_i32 = arith.constant 0 : i32
    %c0_i32_0 = arith.constant 0 : i32
    %c0_i32_1 = arith.constant 0 : i32
    return %arg1, %c0_i32, %c0_i32_0 : i32, i32, i32
  }
  func.func @transform_3(%arg0: i32, %arg1: i32) -> (i32, i32, i32) {
    %c0_i32 = arith.constant 0 : i32
    %c0_i32_0 = arith.constant 0 : i32
    %c0_i32_1 = arith.constant 0 : i32
    return %arg1, %c0_i32, %c0_i32_0 : i32, i32, i32
  }
  func.func @transform_4(%arg0: i32, %arg1: i32) -> (i32, i32, i32) {
    %c0_i32 = arith.constant 0 : i32
    %c0_i32_0 = arith.constant 0 : i32
    %c0_i32_1 = arith.constant 0 : i32
    return %arg1, %c0_i32, %c0_i32_0 : i32, i32, i32
  }
  func.func @transform_5(%arg0: i32, %arg1: i32) -> (i32, i32, i32) {
    %c0_i32 = arith.constant 0 : i32
    %c0_i32_0 = arith.constant 0 : i32
    %c0_i32_1 = arith.constant 0 : i32
    return %arg1, %c0_i32, %c0_i32_0 : i32, i32, i32
  }
  func.func @transform_6(%arg0: i32, %arg1: i32) -> (i32, i32, i32) {
    %c0_i32 = arith.constant 0 : i32
    %c0_i32_0 = arith.constant 0 : i32
    %c0_i32_1 = arith.constant 0 : i32
    return %arg1, %c0_i32, %c0_i32_0 : i32, i32, i32
  }
  func.func @transform_7(%arg0: i32, %arg1: i32) -> (i32, i32, i32) {
    %c0_i32 = arith.constant 0 : i32
    %c0_i32_0 = arith.constant 0 : i32
    %c0_i32_1 = arith.constant 0 : i32
    return %arg1, %c0_i32, %c0_i32_0 : i32, i32, i32
  }
  func.func @transform_8(%arg0: i32, %arg1: i32) -> (i32, i32, i32) {
    %c0_i32 = arith.constant 0 : i32
    %c0_i32_0 = arith.constant 0 : i32
    %c0_i32_1 = arith.constant 0 : i32
    return %arg1, %c0_i32, %c0_i32_0 : i32, i32, i32
  }
  func.func @transform_9(%arg0: i32, %arg1: i32) -> (i32, i32, i32) {
    %c0_i32 = arith.constant 0 : i32
    %c0_i32_0 = arith.constant 0 : i32
    %c0_i32_1 = arith.constant 0 : i32
    return %arg1, %c0_i32, %c0_i32_0 : i32, i32, i32
  }
  func.func @transform_10(%arg0: i32, %arg1: i32) -> (i32, i32, i32) {
    %c0_i32 = arith.constant 0 : i32
    %c0_i32_0 = arith.constant 0 : i32
    %c0_i32_1 = arith.constant 0 : i32
    return %arg1, %c0_i32, %c0_i32_0 : i32, i32, i32
  }
  func.func @transform_11(%arg0: i32, %arg1: i32) -> (i32, i32, i32) {
    %c0_i32 = arith.constant 0 : i32
    %c0_i32_0 = arith.constant 0 : i32
    %c0_i32_1 = arith.constant 0 : i32
    return %arg1, %c0_i32, %c0_i32_0 : i32, i32, i32
  }
  func.func @transform_12(%arg0: i32, %arg1: i32) -> (i32, i32, i32) {
    %c0_i32 = arith.constant 0 : i32
    %c0_i32_0 = arith.constant 0 : i32
    %c0_i32_1 = arith.constant 0 : i32
    return %arg1, %c0_i32, %c0_i32_0 : i32, i32, i32
  }
  func.func @transform_13(%arg0: i32, %arg1: i32) -> (i32, i32, i32) {
    %c0_i32 = arith.constant 0 : i32
    %c0_i32_0 = arith.constant 0 : i32
    %c0_i32_1 = arith.constant 0 : i32
    return %arg1, %c0_i32, %c0_i32_0 : i32, i32, i32
  }
  func.func @transform_14(%arg0: i32, %arg1: i32) -> (i32, i32, i32) {
    %c0_i32 = arith.constant 0 : i32
    %c0_i32_0 = arith.constant 0 : i32
    %c0_i32_1 = arith.constant 0 : i32
    return %arg1, %c0_i32, %c0_i32_0 : i32, i32, i32
  }
  func.func @transform_15(%arg0: i32, %arg1: i32) -> (i32, i32, i32) {
    %c0_i32 = arith.constant 0 : i32
    %c0_i32_0 = arith.constant 0 : i32
    %c0_i32_1 = arith.constant 0 : i32
    return %arg1, %c0_i32, %c0_i32_0 : i32, i32, i32
  }
  func.func @transform_16(%arg0: i32, %arg1: i32) -> (i32, i32, i32) {
    %c0_i32 = arith.constant 0 : i32
    %c0_i32_0 = arith.constant 0 : i32
    %c0_i32_1 = arith.constant 0 : i32
    return %arg1, %c0_i32, %c0_i32_0 : i32, i32, i32
  }
  func.func @transform_17(%arg0: i32, %arg1: i32) -> (i32, i32, i32) {
    %c0_i32 = arith.constant 0 : i32
    %c0_i32_0 = arith.constant 0 : i32
    %c0_i32_1 = arith.constant 0 : i32
    return %arg1, %c0_i32, %c0_i32_0 : i32, i32, i32
  }
  func.func @transform_18(%arg0: i32, %arg1: i32) -> (i32, i32, i32) {
    %c0_i32 = arith.constant 0 : i32
    %c0_i32_0 = arith.constant 0 : i32
    %c0_i32_1 = arith.constant 0 : i32
    return %arg1, %c0_i32, %c0_i32_0 : i32, i32, i32
  }
  func.func @transform_19(%arg0: i32, %arg1: i32) -> (i32, i32, i32) {
    %c0_i32 = arith.constant 0 : i32
    %c0_i32_0 = arith.constant 0 : i32
    %c0_i32_1 = arith.constant 0 : i32
    return %arg1, %c0_i32, %c0_i32_0 : i32, i32, i32
  }
  func.func @transform_20(%arg0: i32, %arg1: i32) -> (i32, i32, i32) {
    %c0_i32 = arith.constant 0 : i32
    %c0_i32_0 = arith.constant 0 : i32
    %c0_i32_1 = arith.constant 0 : i32
    return %arg1, %c0_i32, %c0_i32_0 : i32, i32, i32
  }
  func.func @transform_21(%arg0: i32, %arg1: i32) -> (i32, i32, i32) {
    %c0_i32 = arith.constant 0 : i32
    %c0_i32_0 = arith.constant 0 : i32
    %c0_i32_1 = arith.constant 0 : i32
    return %arg1, %c0_i32, %c0_i32_0 : i32, i32, i32
  }
  func.func @transform_22(%arg0: i32, %arg1: i32) -> (i32, i32, i32) {
    %c0_i32 = arith.constant 0 : i32
    %c0_i32_0 = arith.constant 0 : i32
    %c0_i32_1 = arith.constant 0 : i32
    return %arg1, %c0_i32, %c0_i32_0 : i32, i32, i32
  }
  func.func @transform_23(%arg0: i32, %arg1: i32) -> (i32, i32, i32) {
    %c0_i32 = arith.constant 0 : i32
    %c0_i32_0 = arith.constant 0 : i32
    %c0_i32_1 = arith.constant 0 : i32
    return %arg0, %c0_i32, %c0_i32_0 : i32, i32, i32
  }
}

</mosaic_0001>

<bundles_post_ra>
// kernel: tpu_custom_call.1
= control target key start
LH: loop header
LB: loop body
LE: loop exit
PB: predicated region body
PF: predicated region fallthrough
CT: control target
= control target key end

     0   :  { %s5554_s0 = inlined_call_operand.vmem [shape: f32[2,8,32], index: 0, kind: input, shape index: {}]   ;;  %s5555_s1 = inlined_call_operand.vmem [shape: f32[2,32,32], index: 1, kind: input, shape index: {}]   ;;  %s5556_s2 = inlined_call_operand.vmem [shape: f32[2,1,32], index: 2, kind: input, shape index: {}]   ;;  %s5557_s3 = inlined_call_operand.vmem [shape: f32[2,32,32], index: 3, kind: input, shape index: {}]   ;;  %s5558_s4 = inlined_call_operand.vmem [shape: f32[2,1,32], index: 4, kind: input, shape index: {}]   ;;  %s5559_s5 = inlined_call_operand.vmem [shape: f32[2,32,32], index: 5, kind: input, shape index: {}]   ;;  %s5560_s6 = inlined_call_operand.vmem [shape: f32[2,1,32], index: 6, kind: input, shape index: {}]   ;;  %s5561_s7 = inlined_call_operand.vmem [shape: f32[2,32,32], index: 7, kind: input, shape index: {}]   ;;  %s5562_s8 = inlined_call_operand.vmem [shape: f32[2,1,32], index: 8, kind: input, shape index: {}]   ;;  %s5563_s9 = inlined_call_operand.vmem [shape: f32[2,32,16], index: 9, kind: input, shape index: {}]   ;;  %s5564_s10 = inlined_call_operand.vmem [shape: f32[2,1,16], index: 10, kind: input, shape index: {}]   ;;  %s5565_s11 = inlined_call_operand.vmem [shape: f32[2,16,32], index: 11, kind: input, shape index: {}]   ;;  %s5566_s12 = inlined_call_operand.vmem [shape: f32[2,1,32], index: 12, kind: input, shape index: {}]   ;;  %s5567_s13 = inlined_call_operand.vmem [shape: f32[2,16,32], index: 13, kind: input, shape index: {}]   ;;  %s5568_s14 = inlined_call_operand.vmem [shape: f32[2,1,32], index: 14, kind: input, shape index: {}]   ;;  %s5569_s15 = inlined_call_operand.vmem [shape: f32[2,32,512], index: 15, kind: input, shape index: {}]   ;;  %s5570_s16 = inlined_call_operand.vmem [shape: f32[2,1,512], index: 16, kind: input, shape index: {}]   ;;  %s5571_s17 = inlined_call_operand.vmem [shape: f32[2,512,32], index: 17, kind: input, shape index: {}]   ;;  %s5572_s18 = inlined_call_operand.vmem [shape: f32[2,1,32], index: 18, kind: input, shape index: {}]   ;;  %s5573_s19 = inlined_call_operand.vmem [shape: f32[2,1,32], index: 19, kind: input, shape index: {}]   ;;  %s5574_s20 = inlined_call_operand.vmem [shape: f32[2,1,32], index: 20, kind: input, shape index: {}]   ;;  %s5575_s21 = inlined_call_operand.vmem [shape: f32[2,1,32], index: 21, kind: input, shape index: {}]   ;;  %s5576_s22 = inlined_call_operand.vmem [shape: f32[2,1,32], index: 22, kind: input, shape index: {}]   ;;  %s5577_s23 = inlined_call_operand.hbm [shape: f32[2,8,32], index: 23, kind: output, shape index: {}]  }
   0x1   :  { %5586 = sst [smem:[#allocation14_spill]] %s5554_s0 }
   0x2   :  { %5587 = sst [smem:[#allocation15_spill]] %s5555_s1 }
   0x3   :  { %5588 = sst [smem:[#allocation16_spill]] %s5556_s2 }
   0x4   :  { %5589 = sst [smem:[#allocation17_spill]] %s5557_s3 }
   0x5   :  { %5590 = sst [smem:[#allocation18_spill]] %s5558_s4 }
   0x6   :  { %5591 = sst [smem:[#allocation19_spill]] %s5559_s5 }
   0x7   :  { %5592 = sst [smem:[#allocation20_spill]] %s5560_s6 }
   0x8   :  { %5593 = sst [smem:[#allocation21_spill]] %s5561_s7 }
   0x9   :  { %5594 = sst [smem:[#allocation22_spill]] %s5562_s8 }
   0xa   :  { %5595 = sst [smem:[#allocation23_spill]] %s5563_s9 }
   0xb   :  { %5596 = sst [smem:[#allocation24_spill]] %s5565_s11 }
   0xc   :  { %5597 = sst [smem:[#allocation25_spill]] %s5567_s13 }
   0xd   :  { %5598 = sst [smem:[#allocation26_spill]] %s5569_s15 }
   0xe   :  { %5599 = sst [smem:[#allocation27_spill]] %s5570_s16 }
   0xf   :  { %5600 = sst [smem:[#allocation28_spill]] %s5572_s18 }
  0x10   :  { %5601 = sst [smem:[#allocation29_spill]] %s5573_s19 }
  0x11   :  { %5602 = sst [smem:[#allocation30_spill]] %s5574_s20 }
  0x12   :  { %5603 = sst [smem:[#allocation31_spill]] %s5575_s21 }
  0x13   :  { %5604 = sst [smem:[#allocation32_spill]] %s5576_s22 }
  0x14   :  { %5605 = sst [smem:[#allocation33_spill]] %s5577_s23 }
  0x15   :  { %28 = vsyncpa [#allocation4], 0  ;;  %s5002_s4 = smov 0   ;;  %s5004_s30 = smov 0  }
  0x16   :  { %s5006_s24 = smov 0  }
  0x17 LB: > { %5606 = sst [smem:[#allocation6_spill]] %s4864_s4  ;;  %s43_s5 = sadd.s32 1, %s4868_s30  ;;  %s4872_s24 = sphi %s5006_s24, %s34_s24   ;;  %s4868_s30 = sphi %s5004_s30, %s5663_s30   ;;  %s4864_s4 = sphi %s5002_s4, %s5662_s4  }
  0x18   : > { %5607 = sst [smem:[#allocation7_spill]] %s4868_s30  ;;  %p44_p0 = scmp.ge.s32.totalorder %s43_s5, 2 }
  0x19   : > { %5608 = sst [smem:[#allocation8_spill]] %s4872_s24  ;;  %p4174_p1 = scmp.ge.s32.totalorder %s4872_s24, 1 }
  0x1a   : > { %p846_p2 = scmp.lt.s32.totalorder %s4872_s24, 3  ;;  %s5665_s5 = smov (%p44_p0, %s43_s5), 0 }
  0x1b   : > { %5609 = sst [smem:[#allocation9_spill]] %s5665_s5 }
  0x1c   : > { %p847_p3 = pnand %p4174_p1, %p846_p2 }
  0x1e   : > { %850 = sbr.rel (%p847_p3) target bundleno = 3830 (0xef6), region = 112 }
  0x25   : > { %p996_p4 = scmp.lt.s32.totalorder %s4864_s4, 1  ;;  %s5611_s3 = sld [smem:[#allocation15_spill]] }
  0x26   : > { %s5613_s30 = sld [smem:[#allocation17_spill]]  ;;  %s5616_s2 = sld [smem:[#allocation19_spill]] }
  0x27   : > { %s5025_s1 = scalar_select %p996_p4, %s4864_s4, 1 }
  0x28   : > { %s5618_s25 = sld [smem:[#allocation21_spill]]  ;;  %s5620_s9 = sld [smem:[#allocation23_spill]] }
  0x29   : > { %s4265_s26 = sshll.u32 %s5025_s1, 5  ;;  %s4270_s7 = sshll.u32 %s5025_s1, 4 }
  0x2a   : > { %s5621_s11 = sld [smem:[#allocation24_spill]]  ;;  %s5622_s13 = sld [smem:[#allocation25_spill]] }
  0x2b   : > { %s5035_s0 = scalar_lea.vmem %s5611_s3, %s4265_s26  ;;  %s4272_s3 = sshll.u32 %s5025_s1, 7 }
  0x2c   : > { %5612 = sst [smem:[#allocation10_spill]] %s5035_s0  ;;  %s5040_s23 = scalar_lea.vmem %s5613_s30, %s4265_s26 }
  0x2d   : > { %5614 = sst [smem:[#allocation11_spill]] %s5040_s23  ;;  %s5049_s6 = scalar_lea.vmem %s5616_s2, %s4265_s26 }
  0x2e   : > { %s5058_s30 = scalar_lea.vmem %s5618_s25, %s4265_s26  ;;  %s5067_s20 = scalar_lea.vmem %s5620_s9, %s4265_s26 }
  0x2f   : > { %s4191_s21 = sshll.u32 %s5025_s1, 2  ;;  %s5623_s15 = sld [smem:[#allocation26_spill]] }
  0x30   : > { %s5077_s29 = scalar_lea.vmem %s5621_s11, %s4270_s7  ;;  %s5086_s26 = scalar_lea.vmem %s5622_s13, %s4270_s7 }
  0x31   : > { %s5625_s16 = sld [smem:[#allocation27_spill]]  ;;  %s4273_s25 = sshll.u32 %s5025_s1, 9 }
  0x32   : > { %s5112_s24 = scalar_lea.vmem %s5571_s17, %s4273_s25  ;;  %s5628_s9 = sld [smem:[#allocation29_spill]] }
  0x33   : > { %s5631_s7 = sld [smem:[#allocation32_spill]]  ;;  %s5632_s18 = sld [smem:[#allocation6_spill]] }
  0x35   : > { %s5097_s0 = scalar_lea.vmem %s5623_s15, %s4272_s3 }
  0x36   : > { %5624 = sst [smem:[#allocation12_spill]] %s5097_s0  ;;  %s5629_s0 = sld [smem:[#allocation30_spill]] }
  0x37   : > { %s5102_s23 = scalar_lea.vmem %s5625_s16, %s4191_s21  ;;  %s5630_s16 = sld [smem:[#allocation31_spill]] }
  0x38   : > { %5626 = sst [smem:[#allocation13_spill]] %s5102_s23  ;;  %s1071_s3 = scalar_lea.vmem %s5628_s9, %s5025_s1 }
  0x39   : > { %s1080_s19 = scalar_lea.vmem %s5631_s7, %s5025_s1  ;;  %p4194_p5 = scmp.ne.s32.totalorder %s5632_s18, 0 }
  0x3a   : > { %s5633_s22 = sld [smem:[#allocation14_spill]] (!%p4194_p5)  ;;  %vm1088_vm0 = vcmask (!%p4194_p5), 261120  }
  0x3b   : > { %1085 = sbr.rel (%p4194_p5) target bundleno = 66 (0x42), region = 116 }
  0x3c   : > { %s1074_s11 = scalar_lea.vmem %s5629_s0, %s5025_s1 }
  0x3d   : > { %s1077_s23 = scalar_lea.vmem %s5630_s16, %s5025_s1 }
  0x40   : > { %v1086_v0 = vld [vmem:[%s5633_s22] sm:$0xff] (!%p4194_p5)  ;;  %v1087_v1 = vld [vmem:[%s5633_s22 + $0x8] sm:$0xff] (!%p4194_p5) }
  0x41   : > { %1089 = vst.msk [vmem:[#allocation2] sm:$0xff] (!%p4194_p5), %vm1088_vm0, %v1086_v0  ;;  %1090 = vst.msk [vmem:[#allocation2 + $0x8] sm:$0xff] (!%p4194_p5), %vm1088_vm0, %v1087_v1 }
  0x42 PF: > { %v1111_v2 = vld [vmem:[%s5067_s20] sm:$0xff]  ;;  %v1112_v3 = vld [vmem:[%s5067_s20 + $0x8] sm:$0xff]  ;;  %v1113_v4 = vld [vmem:[%s5067_s20 + $0x10] sm:$0xff]  ;;  %vm1216_vm1 = vcmask 261120   ;;  %s5634_s8 = sld [smem:[#allocation10_spill]]  ;;  %s5635_s15 = sld [smem:[#allocation11_spill]] }
  0x43   : > { %v4584_v5 = vpack.c.bf16 %v1112_v3, %v1111_v2  ;;  %v1114_v6 = vld [vmem:[%s5067_s20 + $0x18] sm:$0xff]  ;;  %v1116_v10 = vld [vmem:[%s5077_s29] sm:$0xff]  ;;  %v1117_v11 = vld [vmem:[%s5077_s29 + $0x8] sm:$0xff]  ;;  %s5636_s20 = scalar_lea.vmem %s5564_s10, %s5025_s1  ;;  %vm1306_vm2 = vcmask 130048   ;;  %v4874_v37 = vmov 0.0   ;;  %vm4875_vm3 = vmmov 0   ;;  %s5637_s0 = scalar_lea.vmem %s5566_s12, %s5025_s1 }
  0x44   : > { %v4588_v8 = vpack.c.bf16 %v1114_v6, %v1113_v4  ;;  %v4592_v12 = vpack.c.bf16 %v1117_v11, %v1116_v10  ;;  %v1119_v13 = vld [vmem:[%s5086_s26] sm:$0xff]  ;;  %v1120_v14 = vld [vmem:[%s5086_s26 + $0x8] sm:$0xff]  ;;  %v1103_v40 = vld [vmem:[%s5049_s6 + $0x10] sm:$0xff]  ;;  %s5638_s27 = scalar_lea.vmem %s5568_s14, %s5025_s1  ;;  %s5639_s4 = sld [smem:[#allocation16_spill]]  ;;  %vm1742_vm4 = vcmask 64512  }
  0x45   : > { %4585 = vmatprep.subr.bf16.mxu0 %v4584_v5  ;;  %v4596_v15 = vpack.c.bf16 %v1120_v14, %v1119_v13  ;;  %v4195_v22 = vld [vmem:[%s5636_s20] ss:$0 sm:$0xff]  ;;  %v1102_v39 = vld [vmem:[%s5049_s6 + $0x8] sm:$0xff]  ;;  %v1104_v42 = vld [vmem:[%s5049_s6 + $0x18] sm:$0xff]  ;;  %s5641_s13 = sld [smem:[#allocation18_spill]]  ;;  %s5643_s18 = sld [smem:[#allocation20_spill]] }
  0x46   : > { %4587 = vmatpush3.bf16.msra.mxu0 %v4584_v5  ;;  %4593 = vmatprep.subr.bf16.mxu1 %v4592_v12  ;;  %v1101_v38 = vld [vmem:[%s5049_s6] sm:$0xff]  ;;  %v4620_v43 = vpack.c.bf16 %v1104_v42, %v1103_v40  ;;  %s4877_s29 = smov 112   ;;  %s4878_s26 = smov 104  }
  0x47   : > { %4589 = vmatprep.subr.bf16.mxu0 %v4588_v8  ;;  %4595 = vmatpush3.bf16.msra.mxu1 %v4592_v12  ;;  %v4616_v41 = vpack.c.bf16 %v1102_v39, %v1101_v38  ;;  %v4198_v44 = vld [vmem:[%s5637_s0] ss:$0 sm:$0xff]  ;;  %s5645_s6 = sld [smem:[#allocation22_spill]] }
  0x48   : > { %v5141_v7 = vld [vmem:[#allocation2] sm:$0xff]  ;;  %v5145_v9 = vld [vmem:[#allocation2 + $0x8] sm:$0xff]  ;;  %4597 = vmatprep.subr.bf16.mxu1 %v4596_v15  ;;  %v1093_v19 = vld [vmem:[%s5634_s8 + $0x10] sm:$0xff] }
  0x49   : > { %4434 = vmatprep.mubr.msk.f32.mxu0 %vm1216_vm1, %v5141_v7  ;;  %v1091_v16 = vld [vmem:[%s5634_s8] sm:$0xff]  ;;  %v1092_v17 = vld [vmem:[%s5634_s8 + $0x8] sm:$0xff]  ;;  %v1094_v20 = vld [vmem:[%s5634_s8 + $0x18] sm:$0xff]  ;;  %s4876_s8 = smov 120  }
  0x4a   : > { %4591 = vmatpush3.bf16.msra.mxu0 %v4588_v8  ;;  %v4600_v18 = vpack.c.bf16 %v1092_v17, %v1091_v16  ;;  %v4604_v21 = vpack.c.bf16 %v1094_v20, %v1093_v19  ;;  %v1096_v27 = vld [vmem:[%s5635_s15] sm:$0xff]  ;;  %v1097_v28 = vld [vmem:[%s5635_s15 + $0x8] sm:$0xff]  ;;  %v1098_v32 = vld [vmem:[%s5635_s15 + $0x10] sm:$0xff]  ;;  %s5640_s7 = scalar_lea.vmem %s5639_s4, %s5025_s1 }
  0x4b   : > { %v4608_v31 = vpack.c.bf16 %v1097_v28, %v1096_v27  ;;  %v1099_v33 = vld [vmem:[%s5635_s15 + $0x18] sm:$0xff]  ;;  %v4203_v49 = vld [vmem:[%s5638_s27] ss:$0 sm:$0xff]  ;;  %s5642_s2 = scalar_lea.vmem %s5641_s13, %s5025_s1  ;;  %s5644_s20 = scalar_lea.vmem %s5643_s18, %s5025_s1 }
  0x4c   : > { %4601 = vmatprep.subr.bf16.mxu0 %v4600_v18  ;;  %v4612_v34 = vpack.c.bf16 %v1099_v33, %v1098_v32  ;;  %v4208_v4 = vld [vmem:[%s5640_s7] ss:$0 sm:$0xff]  ;;  %s5647_s27 = sld [smem:[#allocation12_spill]]  ;;  %s5651_s13 = sld [smem:[#allocation28_spill]] }
  0x4d   : > { %4435 = vmatmul.mubr.msk.f32.vlgmr.msra.gmra.mrb[0].mxu0 %vm1216_vm1, %v5145_v9  ;;  %v4211_v5 = vld [vmem:[%s5642_s2] ss:$0 sm:$0xff]  ;;  %s5646_s9 = scalar_lea.vmem %s5645_s6, %s5025_s1 }
  0x4e   : > { %4459 = vmatprep.mubr.msk.f32.mxu0 %vm1216_vm1, %v5141_v7  ;;  %4603 = vmatpush3.bf16.msra.mxu0 %v4600_v18 }
  0x4f   : > { %4605 = vmatprep.subr.bf16.mxu0 %v4604_v21 }
  0x52   : > { %4607 = vmatpush3.bf16.msra.mxu0 %v4604_v21  ;;  %s5652_s2 = scalar_lea.vmem %s5651_s13, %s5025_s1 }
  0x53   : > { %4617 = vmatprep.subr.bf16.mxu0 %v4616_v41 }
  0x55   : > { %4460 = vmatmul.mubr.msk.f32.vlgmr.msra.gmra.mrb[2].mxu0 %vm1216_vm1, %v5145_v9 }
  0x56   : > { %4481 = vmatprep.mubr.msk.f32.mxu0 %vm1216_vm1, %v5141_v7  ;;  %4619 = vmatpush3.bf16.msra.mxu0 %v4616_v41 }
  0x57   : > { %4621 = vmatprep.subr.bf16.mxu0 %v4620_v43 }
  0x5a   : > { %4623 = vmatpush3.bf16.msra.mxu0 %v4620_v43 }
  0x5b   : > { %4504 = vmatprep.subr.mxu0 %v4874_v37 }
  0x5d   : > { %4482 = vmatmul.mubr.msk.f32.vlgmr.msra.gmra.mrb[4].mxu0 %vm1216_vm1, %v5145_v9 }
  0x5e   : > { %4506 = vmatprep.mubr.msk.f32.mxu0 %vm4875_vm3, %v4874_v37 }
 0x120   : > { %v4436_v23 = vpop.f32.mrb[0].mxu0 }
 0x121   : > { %v1295_v24 = vadd.f32 %v4436_v23, %v4195_v22  ;;  %v1289_v25 = vpop.f32.mrb[1].mxu0 }
 0x122   : > { %v1290_v26 = vadd.f32 %v4195_v22, %v1289_v25 }
 0x123   : > { %v1299_v30 = vmax.f32 %v1295_v24, 0.0 }
 0x124   : > { %v1298_v29 = vmax.f32 %v1290_v26, 0.0 }
 0x126   : > { %4441 = vmatprep.mubr.msk.f32.mxu1 %vm1306_vm2, %v1298_v29 }
 0x127   : > { %4442 = vmatmul.mubr.msk.f32.vlgmr.msra.gmra.mrb[0].mxu1 %vm1306_vm2, %v1299_v30 }
 0x128   : > { %4599 = vmatpush3.bf16.msra.mxu1 %v4596_v15  ;;  %4448 = vmatprep.mubr.msk.f32.mxu1 %vm1306_vm2, %v1298_v29  ;;  %v4461_v35 = vpop.f32.mrb[2].mxu0  ;;  %v4214_v29 = vld [vmem:[%s5644_s20] ss:$0 sm:$0xff] }
 0x129   : > { %4609 = vmatprep.subr.bf16.mxu1 %v4608_v31  ;;  %v1565_v36 = vpop.f32.mrb[3].mxu0  ;;  %v1571_v6 = vadd.f32 %v4461_v35, %v4208_v4 }
 0x12a   : > { %v1566_v10 = vadd.f32 %v4208_v4, %v1565_v36 }
 0x12b   : > { %4449 = vmatmul.mubr.msk.f32.vlgmr.msra.gmra.mrb[2].mxu1 %vm1306_vm2, %v1299_v30 }
 0x12c   : > { %4611 = vmatpush3.bf16.msra.mxu1 %v4608_v31  ;;  %4470 = vmatprep.mubr.msk.f32.mxu1 %vm1216_vm1, %v5141_v7 }
 0x12d   : > { %4613 = vmatprep.subr.bf16.mxu1 %v4612_v34 }
 0x130   : > { %4615 = vmatpush3.bf16.msra.mxu1 %v4612_v34  ;;  %v4483_v22 = vpop.f32.mrb[4].mxu0 }
 0x131   : > { %4484 = vmatprep.subr.mxu1 %v4874_v37  ;;  %v1733_v30 = vpop.f32.mrb[5].mxu0  ;;  %v5248_v32 = vadd.f32 %v4483_v22, %v4214_v29 }
 0x132   : > { %v5243_v31 = vadd.f32 %v4214_v29, %v1733_v30 }
 0x133   : > { %4471 = vmatmul.mubr.msk.f32.vlgmr.msra.gmra.mrb[4].mxu1 %vm1216_vm1, %v5145_v9 }
 0x134   : > { %4486 = vmatprep.mubr.msk.f32.mxu1 %vm4875_vm3, %v4874_v37 }
 0x1fa   : > { %v4443_v45 = vpop.f32.mrb[0].mxu1 }
 0x1fb   : > { %v1385_v46 = vadd.f32 %v4443_v45, %v4198_v44  ;;  %v1379_v47 = vpop.f32.mrb[1].mxu1 }
 0x1fc   : > { %v1380_v48 = vadd.f32 %v4198_v44, %v1379_v47 }
 0x1fd   : > { %v4202_v50 = vmul.f32 -1.442695, %v1385_v46 }
 0x1fe   : > { %v4201_v51 = vmul.f32 -1.442695, %v1380_v48  ;;  %v4450_v52 = vpop.f32.mrb[2].mxu1 }
 0x1ff   : > { %4748 = vpow2.f32 %v4202_v50  ;;  %v1478_v53 = vadd.f32 %v4450_v52, %v4203_v49  ;;  %v1472_v54 = vpop.f32.mrb[3].mxu1 }
 0x200   : > { %4750 = vpow2.f32 %v4201_v51  ;;  %v1473_v55 = vadd.f32 %v4203_v49, %v1472_v54 }
 0x201   : > { %v4207_v56 = vmul.f32 -1.442695, %v1478_v53 }
 0x202   : > { %v4206_v57 = vmul.f32 -1.442695, %v1473_v55 }
 0x203   : > { %4752 = vpow2.f32 %v4207_v56 }
 0x204   : > { %4754 = vpow2.f32 %v4206_v57 }
 0x206   : > { %v4472_v58 = vpop.f32.mrb[4].mxu1 }
 0x207   : > { %v1650_v59 = vpop.f32.mrb[5].mxu1  ;;  %v1656_v13 = vadd.f32 %v4472_v58, %v4211_v5 }
 0x208   : > { %v1651_v15 = vadd.f32 %v4211_v5, %v1650_v59 }
 0x209   : > { %v4749_v60 = vpop.eup %4748 }
 0x20a   : > { %v4751_v61 = vpop.eup %4750  ;;  %v1395_v62 = vadd.f32 1.0, %v4749_v60 }
 0x20b   : > { %v1394_v63 = vadd.f32 1.0, %v4751_v61 }
 0x20c   : > { %4756 = vrcp.f32 %v1395_v62 }
 0x20d   : > { %v4753_v0 = vpop.eup %4752  ;;  %4758 = vrcp.f32 %v1394_v63 }
 0x20e   : > { %v4755_v1 = vpop.eup %4754  ;;  %v1488_v2 = vadd.f32 1.0, %v4753_v0 }
 0x20f   : > { %v1487_v3 = vadd.f32 1.0, %v4755_v1 }
 0x210   : > { %4760 = vrcp.f32 %v1488_v2 }
 0x211   : > { %4762 = vrcp.f32 %v1487_v3 }
 0x216   : > { %v4757_v8 = vpop.eup %4756 }
 0x217   : > { %v4759_v11 = vpop.eup %4758  ;;  %v1575_v12 = vmul.f32 0.35355338, %v4757_v8 }
 0x218   : > { %v1574_v14 = vmul.f32 0.35355338, %v4759_v11 }
 0x219   : > { %v5208_v16 = vmul.f32 %v1575_v12, %v1571_v6  ;;  %v1107_v12 = vld [vmem:[%s5058_s30 + $0x8] sm:$0xff] }
 0x21a   : > { %v4761_v17 = vpop.eup %4760  ;;  %v5210_v18 = vmul.f32 %v1574_v14, %v1566_v10 }
 0x21b   : > { %v4763_v19 = vpop.eup %4762  ;;  %v5212_v20 = vmul.f32 %v4761_v17, %v1656_v13  ;;  %v1106_v13 = vld [vmem:[%s5058_s30] sm:$0xff] }
 0x21c   : > { %v5214_v21 = vmul.f32 %v4763_v19, %v1651_v15 }
 0x21d   : > { %2145 = vrot.lane.b32.xlu1 %v5212_v20, %s4876_s8 }
 0x21e   : > { %4485 = vmatpush3.xpose.msk.msra.mxu1 %vm1742_vm4, %v5214_v21 }
 0x21f   : > { %4489 = vmatprep.subr.mxu1 %v4874_v37 }
 0x221   : > { %2143 = vrot.lane.b32.xlu1 %v5208_v16, %s4876_s8  ;;  %4487 = vmatmul.mubr.msk.f32.vlgmr.msra.gmra.mrb[6].mxu1 %vm1742_vm4, %v5210_v18 }
 0x222   : > { %4490 = vmatpush3.xpose.msk.msra.mxu1 %vm1742_vm4, %v5212_v20  ;;  %4491 = vmatprep.mubr.msk.f32.mxu1 %vm4875_vm3, %v4874_v37 }
 0x223   : > { %4494 = vmatprep.subr.mxu1 %v4874_v37 }
 0x225   : > { %2065 = vrot.lane.b32.xlu1 %v5210_v18, %s4876_s8  ;;  %4492 = vmatmul.mubr.msk.f32.vlgmr.msra.gmra.mrb[8].mxu1 %vm1742_vm4, %v5208_v16 }
 0x226   : > { %4496 = vmatprep.mubr.msk.f32.mxu1 %vm4875_vm3, %v4874_v37  ;;  %4495 = vmatpush3.msra.mxu1 %v5243_v31 }
 0x227   : > { %4499 = vmatprep.subr.mxu1 %v4874_v37 }
 0x28f   : > { %v2146_v33 = vpop.permute.xlu1 %2145 }
 0x293   : > { %v2144_v39 = vpop.permute.xlu1 %2143 }
 0x297   : > { %v2066_v43 = vpop.permute.xlu1 %2065 }
 0x2f4   : > { %v1815_v23 = vpop.f32.mrb[6].mxu1 }
 0x2f5   : > { %v4488_v24 = vpop.f32.mrb[7].mxu1  ;;  %v1895_v25 = vsel %vm1742_vm4, %v1815_v23, -inf }
 0x2f6   : > { %1896 = vmax.xlane.f32.xlu0 %v1895_v25 }
 0x2f8   : > { %v1891_v26 = vpop.f32.mrb[8].mxu1 }
 0x2f9   : > { %v4493_v27 = vpop.f32.mrb[9].mxu1  ;;  %v1898_v28 = vsel %vm1742_vm4, %v1891_v26, -inf }
 0x2fa   : > { %1899 = vmax.xlane.f32.xlu0 %v1898_v28 }
 0x310   : > { %2067 = vrot.lane.b32.xlu0 %v5214_v21, %s4876_s8 }
 0x314   : > { %2321 = vrot.lane.b32.xlu0 %v5248_v32, %s4876_s8 }
 0x318   : > { %2563 = vrot.lane.b32.xlu0 %v5214_v21, %s4877_s29 }
 0x31c   : > { %2561 = vrot.lane.b32.xlu0 %v5210_v18, %s4877_s29 }
 0x320   : > { %2641 = vrot.lane.b32.xlu0 %v5212_v20, %s4877_s29 }
 0x324   : > { %2639 = vrot.lane.b32.xlu0 %v5208_v16, %s4877_s29 }
 0x328   : > { %2244 = vrot.lane.b32.xlu0 %v5243_v31, %s4876_s8 }
 0x383   : > { %v1897_v34 = vpop.xlane.xlu0 %1896 }
 0x384   : > { %v1901_v35 = vsub.f32 %v1815_v23, %v1897_v34 }
 0x386   : > { %v1903_v36 = vmul.f32 1.442695, %v1901_v35 }
 0x387   : > { %v1900_v38 = vpop.xlane.xlu0 %1899 }
 0x388   : > { %4764 = vpow2.f32 %v1903_v36  ;;  %v1902_v40 = vsub.f32 %v1891_v26, %v1900_v38 }
 0x38a   : > { %v1905_v41 = vmul.f32 1.442695, %v1902_v40 }
 0x38b   : > { %v2068_v42 = vpop.permute.xlu0 %2067 }
 0x38c   : > { %4766 = vpow2.f32 %v1905_v41  ;;  %4505 = vmatpush3.xpose.msk.msra.mxu0 %vm1742_vm4, %v2068_v42 }
 0x38d   : > { %4514 = vmatprep.subr.mxu0 %v4874_v37 }
 0x38f   : > { %4507 = vmatmul.mubr.msk.f32.vlgmr.msra.gmra.mrb[6].mxu0 %vm1742_vm4, %v2066_v43  ;;  %v2322_v44 = vpop.permute.xlu0 %2321 }
 0x390   : > { %4516 = vmatprep.mubr.msk.f32.mxu0 %vm4875_vm3, %v4874_v37 }
 0x392   : > { %v4765_v45 = vpop.eup %4764 }
 0x393   : > { %4497 = vmatmul.mubr.msk.f32.vlgmr.msra.gmra.mrb[10].mxu1 %vm1742_vm4, %v4765_v45  ;;  %v2564_v46 = vpop.permute.xlu0 %2563  ;;  %v1907_v10 = vsel %vm1742_vm4, %v4765_v45, 0.0 }
 0x394   : > { %4500 = vmatpush3.msra.mxu1 %v5248_v32  ;;  %4501 = vmatprep.mubr.msk.f32.mxu1 %vm4875_vm3, %v4874_v37 }
 0x395   : > { %4509 = vmatprep.subr.mxu1 %v4874_v37 }
 0x396   : > { %v4767_v47 = vpop.eup %4766 }
 0x397   : > { %4502 = vmatmul.mubr.msk.f32.vlgmr.msra.gmra.mrb[12].mxu1 %vm1742_vm4, %v4767_v47  ;;  %v2562_v48 = vpop.permute.xlu0 %2561  ;;  %v1910_v11 = vsel %vm1742_vm4, %v4767_v47, 0.0 }
 0x398   : > { %4511 = vmatprep.mubr.msk.f32.mxu1 %vm4875_vm3, %v4874_v37 }
 0x39b   : > { %4510 = vmatpush3.xpose.msk.msra.mxu1 %vm1742_vm4, %v2146_v33  ;;  %v2642_v49 = vpop.permute.xlu0 %2641 }
 0x39c   : > { %4519 = vmatprep.subr.mxu1 %v4874_v37 }
 0x39e   : > { %4512 = vmatmul.mubr.msk.f32.vlgmr.msra.gmra.mrb[14].mxu1 %vm1742_vm4, %v2144_v39 }
 0x39f   : > { %v2640_v50 = vpop.permute.xlu0 %2639  ;;  %4520 = vmatpush3.msra.mxu1 %v2322_v44  ;;  %4521 = vmatprep.mubr.msk.f32.mxu1 %vm4875_vm3, %v4874_v37 }
 0x3a0   : > { %4534 = vmatprep.subr.mxu1 %v4874_v37 }
 0x3a3   : > { %v2245_v51 = vpop.permute.xlu0 %2244 }
 0x3a4   : > { %4515 = vmatpush3.msra.mxu0 %v2245_v51 }
 0x3a5   : > { %4524 = vmatprep.subr.mxu0 %v1107_v12 }
 0x462   : > { %v2139_v52 = vpop.f32.mrb[6].mxu0 }
 0x463   : > { %v4508_v53 = vpop.f32.mrb[7].mxu0  ;;  %v2221_v61 = vsel %vm1742_vm4, %v2139_v52, -inf }
 0x466   : > { %v5282_v54 = vpop.f32.mrb[10].mxu1 }
 0x467   : > { %v4498_v55 = vpop.f32.mrb[11].mxu1 }
 0x468   : > { %v1108_v55 = vld [vmem:[%s5058_s30 + $0x10] sm:$0xff] }
 0x46a   : > { %v5284_v56 = vpop.f32.mrb[12].mxu1 }
 0x46b   : > { %v4503_v57 = vpop.f32.mrb[13].mxu1 }
 0x471   : > { %v2217_v58 = vpop.f32.mrb[14].mxu1 }
 0x472   : > { %v4513_v59 = vpop.f32.mrb[15].mxu1  ;;  %v2224_v60 = vsel %vm1742_vm4, %v2217_v58, -inf }
 0x473   : > { %2225 = vmax.xlane.f32.xlu1 %v2224_v60 }
 0x477   : > { %2222 = vmax.xlane.f32.xlu1 %v2221_v61 }
 0x500   : > { %v2226_v62 = vpop.xlane.xlu1 %2225 }
 0x501   : > { %v2228_v63 = vsub.f32 %v2217_v58, %v2226_v62 }
 0x503   : > { %v2231_v0 = vmul.f32 1.442695, %v2228_v63 }
 0x504   : > { %v2223_v1 = vpop.xlane.xlu1 %2222 }
 0x505   : > { %4768 = vpow2.f32 %v2231_v0  ;;  %v2227_v2 = vsub.f32 %v2139_v52, %v2223_v1 }
 0x507   : > { %v2229_v3 = vmul.f32 1.442695, %v2227_v2 }
 0x509   : > { %4770 = vpow2.f32 %v2229_v3 }
 0x50f   : > { %v4769_v4 = vpop.eup %4768 }
 0x510   : > { %4522 = vmatmul.mubr.msk.f32.vlgmr.msra.gmra.mrb[16].mxu1 %vm1742_vm4, %v4769_v4  ;;  %v2236_v5 = vsel %vm1742_vm4, %v4769_v4, 0.0 }
 0x511   : > { %4535 = vmatpush3.xpose.msk.msra.mxu1 %vm1742_vm4, %v2564_v46  ;;  %2237 = vadd.xlane.f32.xlu0 %v2236_v5 }
 0x512   : > { %4536 = vmatprep.mubr.msk.f32.mxu1 %vm4875_vm3, %v4874_v37  ;;  %4539 = vmatprep.subr.mxu1 %v4874_v37 }
 0x513   : > { %v4771_v6 = vpop.eup %4770 }
 0x514   : > { %4517 = vmatmul.mubr.msk.f32.vlgmr.msra.gmra.mrb[8].mxu0 %vm1742_vm4, %v4771_v6  ;;  %4537 = vmatmul.mubr.msk.f32.vlgmr.msra.gmra.mrb[18].mxu1 %vm1742_vm4, %v2562_v48  ;;  %v2233_v8 = vsel %vm1742_vm4, %v4771_v6, 0.0 }
 0x515   : > { %4540 = vmatpush3.xpose.msk.msra.mxu1 %vm1742_vm4, %v2642_v49  ;;  %2234 = vadd.xlane.f32.xlu1 %v2233_v8 }
 0x516   : > { %4541 = vmatprep.mubr.msk.f32.mxu1 %vm4875_vm3, %v4874_v37  ;;  %4549 = vmatprep.subr.mxu1 %v4874_v37 }
 0x517   : > { %4525 = vmatpush3.msra.mxu0 %v1107_v12 }
 0x518   : > { %4542 = vmatmul.mubr.msk.f32.vlgmr.msra.gmra.mrb[20].mxu1 %vm1742_vm4, %v2640_v50  ;;  %4529 = vmatprep.subr.mxu0 %v1106_v13 }
 0x519   : > { %1908 = vadd.xlane.f32.xlu1 %v1907_v10  ;;  %4551 = vmatprep.mubr.msk.f32.mxu1 %vm4875_vm3, %v4874_v37 }
 0x51d   : > { %1911 = vadd.xlane.f32.xlu1 %v1910_v11 }
 0x527   : > { %2815 = vrot.lane.b32.xlu0 %v5248_v32, %s4877_s29 }
 0x59e   : > { %v2238_v14 = vpop.xlane.xlu0 %2237 }
 0x5a2   : > { %v2816_v15 = vpop.permute.xlu0 %2815  ;;  %v2235_v17 = vpop.xlane.xlu1 %2234 }
 0x5a3   : > { %4550 = vmatpush3.msra.mxu1 %v2816_v15  ;;  %4772 = vrcp.f32 %v2235_v17 }
 0x5a4   : > { %4559 = vmatprep.subr.mxu1 %v4874_v37 }
 0x5a6   : > { %v1909_v19 = vpop.xlane.xlu1 %1908 }
 0x5a7   : > { %4774 = vrcp.f32 %v1909_v19 }
 0x5a8   : > { %4776 = vrcp.f32 %v2238_v14 }
 0x5aa   : > { %v1912_v22 = vpop.xlane.xlu1 %1911 }
 0x5ab   : > { %4778 = vrcp.f32 %v1912_v22 }
 0x5ad   : > { %v4773_v25 = vpop.eup %4772 }
 0x5b1   : > { %v4775_v26 = vpop.eup %4774 }
 0x5b2   : > { %v4777_v29 = vpop.eup %4776  ;;  %v2063_v38 = vmul.f32 %v4775_v26, %v5282_v54 }
 0x5b5   : > { %v4779_v42 = vpop.eup %4778 }
 0x5b6   : > { %v2064_v43 = vmul.f32 %v4779_v42, %v5284_v56 }
 0x5e3   : > { %v2393_v23 = vpop.f32.mrb[16].mxu1 }
 0x5e4   : > { %v4523_v24 = vpop.f32.mrb[17].mxu1  ;;  %v2398_v36 = vmul.f32 %v4777_v29, %v2393_v23 }
 0x5e5   : > { %v1109_v24 = vld [vmem:[%s5058_s30 + $0x18] sm:$0xff] }
 0x5e7   : > { %v2316_v27 = vpop.f32.mrb[8].mxu0  ;;  %v2635_v28 = vpop.f32.mrb[18].mxu1 }
 0x5e8   : > { %v2397_v30 = vmul.f32 %v4773_v25, %v2316_v27  ;;  %v4518_v33 = vpop.f32.mrb[9].mxu0  ;;  %v4538_v34 = vpop.f32.mrb[19].mxu1  ;;  %v2717_v35 = vsel %vm1742_vm4, %v2635_v28, -inf }
 0x5e9   : > { %2718 = vmax.xlane.f32.xlu1 %v2717_v35 }
 0x5ea   : > { %4526 = vmatprep.mubr.msk.f32.mxu0 %vm1742_vm4, %v2397_v30 }
 0x5eb   : > { %4527 = vmatmul.mubr.msk.f32.vlgmr.msra.gmra.mrb[10].mxu0 %vm1742_vm4, %v2398_v36  ;;  %v2713_v39 = vpop.f32.mrb[20].mxu1 }
 0x5ec   : > { %4531 = vmatprep.mubr.msk.f32.mxu0 %vm1742_vm4, %v2063_v38  ;;  %v4543_v40 = vpop.f32.mrb[21].mxu1  ;;  %v2720_v41 = vsel %vm1742_vm4, %v2713_v39, -inf  ;;  %4530 = vmatpush3.msra.mxu0 %v1106_v13  ;;  %v4249_v38 = vld [vmem:[%s5646_s9] ss:$0 sm:$0xff] }
 0x5ed   : > { %2721 = vmax.xlane.f32.xlu1 %v2720_v41  ;;  %4544 = vmatprep.subr.mxu0 %v4874_v37 }
 0x5f3   : > { %4532 = vmatmul.mubr.msk.f32.vlgmr.msra.gmra.mrb[10].mxu0 %vm1742_vm4, %v2064_v43 }
 0x5f4   : > { %4546 = vmatprep.mubr.msk.f32.mxu0 %vm4875_vm3, %v4874_v37 }
 0x5fe   : > { %2739 = vrot.lane.b32.xlu1 %v5243_v31, %s4877_s29 }
 0x602   : > { %2978 = vrot.lane.b32.xlu1 %v5214_v21, %s4878_s26 }
 0x676   : > { %v2719_v44 = vpop.xlane.xlu1 %2718 }
 0x677   : > { %v2723_v45 = vsub.f32 %v2635_v28, %v2719_v44 }
 0x679   : > { %v2725_v46 = vmul.f32 1.442695, %v2723_v45 }
 0x67a   : > { %v2722_v47 = vpop.xlane.xlu1 %2721 }
 0x67b   : > { %4780 = vpow2.f32 %v2725_v46  ;;  %v2724_v48 = vsub.f32 %v2713_v39, %v2722_v47 }
 0x67d   : > { %v2727_v49 = vmul.f32 1.442695, %v2724_v48 }
 0x67e   : > { %v2740_v50 = vpop.permute.xlu1 %2739 }
 0x67f   : > { %4782 = vpow2.f32 %v2727_v49  ;;  %4545 = vmatpush3.msra.mxu0 %v2740_v50 }
 0x680   : > { %4554 = vmatprep.subr.mxu0 %v1108_v55 }
 0x682   : > { %v2979_v54 = vpop.permute.xlu1 %2978 }
 0x685   : > { %v4781_v51 = vpop.eup %4780 }
 0x686   : > { %4547 = vmatmul.mubr.msk.f32.vlgmr.msra.gmra.mrb[12].mxu0 %vm1742_vm4, %v4781_v51  ;;  %v2729_v52 = vsel %vm1742_vm4, %v4781_v51, 0.0 }
 0x687   : > { %2730 = vadd.xlane.f32.xlu1 %v2729_v52  ;;  %4555 = vmatpush3.msra.mxu0 %v1108_v55  ;;  %v1127_v55 = vld [vmem:[%s5647_s27 + $0x28] sm:$0xff] }
 0x688   : > { %4564 = vmatprep.subr.mxu0 %v4874_v37 }
 0x689   : > { %v4783_v53 = vpop.eup %4782 }
 0x68a   : > { %4552 = vmatmul.mubr.msk.f32.vlgmr.msra.gmra.mrb[22].mxu1 %vm1742_vm4, %v4783_v53  ;;  %v2732_v21 = vsel %vm1742_vm4, %v4783_v53, 0.0 }
 0x68b   : > { %4560 = vmatpush3.xpose.msk.msra.mxu1 %vm1742_vm4, %v2979_v54  ;;  %2733 = vadd.xlane.f32.xlu0 %v2732_v21  ;;  %v1123_v21 = vld [vmem:[%s5647_s27 + $0x8] sm:$0xff] }
 0x68c   : > { %4561 = vmatprep.mubr.msk.f32.mxu1 %vm4875_vm3, %v4874_v37  ;;  %4569 = vmatprep.subr.mxu1 %v4874_v37 }
 0x698   : > { %2976 = vrot.lane.b32.xlu1 %v5210_v18, %s4878_s26 }
 0x69c   : > { %3054 = vrot.lane.b32.xlu1 %v5208_v16, %s4878_s26 }
 0x6a1   : > { %3056 = vrot.lane.b32.xlu0 %v5212_v20, %s4878_s26 }
 0x714   : > { %v2731_v56 = vpop.xlane.xlu1 %2730 }
 0x715   : > { %4784 = vrcp.f32 %v2731_v56  ;;  %v1125_v56 = vld [vmem:[%s5647_s27 + $0x18] sm:$0xff] }
 0x718   : > { %v2977_v57 = vpop.permute.xlu1 %2976  ;;  %v2734_v18 = vpop.xlane.xlu0 %2733 }
 0x719   : > { %4562 = vmatmul.mubr.msk.f32.vlgmr.msra.gmra.mrb[24].mxu1 %vm1742_vm4, %v2977_v57  ;;  %4786 = vrcp.f32 %v2734_v18  ;;  %v4624_v57 = vpack.c.bf16 %v1127_v55, %v1123_v21  ;;  %v1129_v18 = vld [vmem:[%s5647_s27 + $0x38] sm:$0xff]  ;;  %v1160_v21 = vld [vmem:[%s5112_s24 + $0xa8] sm:$0xff] }
 0x71a   : > { %4571 = vmatprep.mubr.msk.f32.mxu1 %vm4875_vm3, %v4874_v37  ;;  %v1192_v55 = vld [vmem:[%s5112_s24 + $0x1a8] sm:$0xff] }
 0x71c   : > { %v3057_v0 = vpop.permute.xlu0 %3056  ;;  %v3055_v1 = vpop.permute.xlu1 %3054 }
 0x71f   : > { %v4785_v58 = vpop.eup %4784 }
 0x723   : > { %v4787_v61 = vpop.eup %4786 }
 0x759   : > { %v2811_v16 = vpop.f32.mrb[12].mxu0 }
 0x75a   : > { %v2891_v59 = vmul.f32 %v4785_v58, %v2811_v16  ;;  %v4548_v60 = vpop.f32.mrb[13].mxu0  ;;  %v1122_v58 = vld [vmem:[%s5647_s27] sm:$0xff] }
 0x75b   : > { %v1126_v16 = vld [vmem:[%s5647_s27 + $0x20] sm:$0xff] }
 0x75c   : > { %4556 = vmatprep.mubr.msk.f32.mxu0 %vm1742_vm4, %v2891_v59  ;;  %v4632_v59 = vpack.c.bf16 %v1129_v18, %v1125_v56  ;;  %v4626_v60 = vpack.c.bf16 %v1126_v16, %v1122_v58  ;;  %v1143_v58 = vld [vmem:[%s5112_s24 + $0x20] sm:$0xff] }
 0x75d   : > { %v2887_v62 = vpop.f32.mrb[22].mxu1 }
 0x75e   : > { %v2892_v63 = vmul.f32 %v4787_v61, %v2887_v62  ;;  %v4553_v20 = vpop.f32.mrb[23].mxu1  ;;  %v1124_v61 = vld [vmem:[%s5647_s27 + $0x10] sm:$0xff] }
 0x75f   : > { %v1128_v62 = vld [vmem:[%s5647_s27 + $0x30] sm:$0xff]  ;;  %v1131_v20 = vld [vmem:[%s5647_s27 + $0x48] sm:$0xff] }
 0x760   : > { %4557 = vmatmul.mubr.msk.f32.vlgmr.msra.gmra.mrb[10].mxu0 %vm1742_vm4, %v2892_v63  ;;  %v4634_v63 = vpack.c.bf16 %v1128_v62, %v1124_v61  ;;  %v1175_v61 = vld [vmem:[%s5112_s24 + $0x120] sm:$0xff]  ;;  %v1176_v62 = vld [vmem:[%s5112_s24 + $0x128] sm:$0xff] }
 0x761   : > { %4565 = vmatpush3.xpose.msk.msra.mxu0 %vm1742_vm4, %v3057_v0  ;;  %4566 = vmatprep.mubr.msk.f32.mxu0 %vm4875_vm3, %v4874_v37  ;;  %v1135_v0 = vld [vmem:[%s5647_s27 + $0x68] sm:$0xff] }
 0x762   : > { %4574 = vmatprep.subr.mxu0 %v4874_v37 }
 0x764   : > { %4567 = vmatmul.mubr.msk.f32.vlgmr.msra.gmra.mrb[14].mxu0 %vm1742_vm4, %v3055_v1  ;;  %v1133_v1 = vld [vmem:[%s5647_s27 + $0x58] sm:$0xff] }
 0x765   : > { %4576 = vmatprep.mubr.msk.f32.mxu0 %vm4875_vm3, %v4874_v37 }
 0x7ec   : > { %v3050_v2 = vpop.f32.mrb[24].mxu1 }
 0x7ed   : > { %v4563_v3 = vpop.f32.mrb[25].mxu1  ;;  %v3132_v4 = vsel %vm1742_vm4, %v3050_v2, -inf }
 0x7ee   : > { %3133 = vmax.xlane.f32.xlu1 %v3132_v4  ;;  %v1137_v3 = vld [vmem:[%s5647_s27 + $0x78] sm:$0xff]  ;;  %v1130_v4 = vld [vmem:[%s5647_s27 + $0x40] sm:$0xff] }
 0x7ff   : > { %3154 = vrot.lane.b32.xlu1 %v5243_v31, %s4878_s26 }
 0x837   : > { %v3128_v5 = vpop.f32.mrb[14].mxu0 }
 0x838   : > { %v4568_v6 = vpop.f32.mrb[15].mxu0  ;;  %v3135_v8 = vsel %vm1742_vm4, %v3128_v5, -inf }
 0x839   : > { %3136 = vmax.xlane.f32.xlu0 %v3135_v8  ;;  %v4636_v6 = vpack.c.bf16 %v1137_v3, %v1133_v1  ;;  %v1193_v1 = vld [vmem:[%s5112_s24 + $0x1b0] sm:$0xff]  ;;  %v1194_v3 = vld [vmem:[%s5112_s24 + $0x1b8] sm:$0xff] }
 0x84f   : > { %3230 = vrot.lane.b32.xlu0 %v5248_v32, %s4878_s26  ;;  %s5655_s26 = sld [smem:[#allocation6_spill]] }
 0x855   : > { %p4259_p6 = scmp.ge.s32.totalorder %s5655_s26, 1 }
 0x87b   : > { %v3134_v10 = vpop.xlane.xlu1 %3133 }
 0x87c   : > { %v3138_v11 = vsub.f32 %v3050_v2, %v3134_v10  ;;  %v4628_v2 = vpack.c.bf16 %v1135_v0, %v1131_v20  ;;  %v1132_v10 = vld [vmem:[%s5647_s27 + $0x50] sm:$0xff]  ;;  %v1162_v0 = vld [vmem:[%s5112_s24 + $0xb8] sm:$0xff] }
 0x87d   : > { %v1161_v20 = vld [vmem:[%s5112_s24 + $0xb0] sm:$0xff] }
 0x87e   : > { %v3140_v12 = vmul.f32 1.442695, %v3138_v11  ;;  %v1136_v11 = vld [vmem:[%s5647_s27 + $0x70] sm:$0xff] }
 0x87f   : > { %v3155_v13 = vpop.permute.xlu1 %3154 }
 0x880   : > { %4788 = vpow2.f32 %v3140_v12  ;;  %4570 = vmatpush3.msra.mxu1 %v3155_v13  ;;  %v4638_v12 = vpack.c.bf16 %v1136_v11, %v1132_v10  ;;  %v1155_v13 = vld [vmem:[%s5112_s24 + $0x80] sm:$0xff]  ;;  %v1177_v10 = vld [vmem:[%s5112_s24 + $0x130] sm:$0xff]  ;;  %v1178_v11 = vld [vmem:[%s5112_s24 + $0x138] sm:$0xff] }
 0x881   : > { %4625 = vmatprep.subr.bf16.mxu1 %v4624_v57 }
 0x88a   : > { %v4789_v14 = vpop.eup %4788 }
 0x88b   : > { %4572 = vmatmul.mubr.msk.f32.vlgmr.msra.gmra.mrb[26].mxu1 %vm1742_vm4, %v4789_v14  ;;  %v3144_v31 = vsel %vm1742_vm4, %v4789_v14, 0.0  ;;  %v1156_v14 = vld [vmem:[%s5112_s24 + $0x88] sm:$0xff] }
 0x88c   : > { %3145 = vadd.xlane.f32.xlu1 %v3144_v31  ;;  %3535 = vmatprep.mubr.f32.mxu1 %v4874_v37  ;;  %v1187_v31 = vld [vmem:[%s5112_s24 + $0x180] sm:$0xff] }
 0x88d   : > { %4627 = vmatpush1.bf16.msra.mxu1 %v4626_v60  ;;  %v1144_v60 = vld [vmem:[%s5112_s24 + $0x28] sm:$0xff] }
 0x88e   : > { %4629 = vmatprep.subr.bf16.mxu1 %v4628_v2  ;;  %v4652_v2 = vpack.c.bf16 %v1162_v0, %v1161_v20 }
 0x8c6   : > { %v3137_v15 = vpop.xlane.xlu0 %3136 }
 0x8c7   : > { %v3139_v17 = vsub.f32 %v3128_v5, %v3137_v15  ;;  %v1134_v5 = vld [vmem:[%s5647_s27 + $0x60] sm:$0xff]  ;;  %v4640_v15 = vpack.c.bf16 %v1156_v14, %v1155_v13  ;;  %v1164_v14 = vld [vmem:[%s5112_s24 + $0xc8] sm:$0xff] }
 0x8c8   : > { %v4630_v8 = vpack.c.bf16 %v1134_v5, %v1130_v4  ;;  %v1145_v4 = vld [vmem:[%s5112_s24 + $0x30] sm:$0xff]  ;;  %v1146_v5 = vld [vmem:[%s5112_s24 + $0x38] sm:$0xff]  ;;  %v1163_v13 = vld [vmem:[%s5112_s24 + $0xc0] sm:$0xff] }
 0x8c9   : > { %v3142_v19 = vmul.f32 1.442695, %v3139_v17  ;;  %v1188_v17 = vld [vmem:[%s5112_s24 + $0x188] sm:$0xff] }
 0x8ca   : > { %v3231_v22 = vpop.permute.xlu0 %3230  ;;  %4631 = vmatpush1.bf16.msra.mxu1 %v4630_v8  ;;  %v4654_v8 = vpack.c.bf16 %v1146_v5, %v1145_v4 }
 0x8cb   : > { %4790 = vpow2.f32 %v3142_v19  ;;  %4575 = vmatpush3.msra.mxu0 %v3231_v22  ;;  %v4672_v19 = vpack.c.bf16 %v1188_v17, %v1187_v31  ;;  %4641 = vmatprep.subr.bf16.mxu1 %v4640_v15  ;;  %v1195_v31 = vld [vmem:[%s5112_s24 + $0x1c0] sm:$0xff]  ;;  %v4656_v15 = vpack.c.bf16 %v1164_v14, %v1163_v13  ;;  %v1196_v17 = vld [vmem:[%s5112_s24 + $0x1c8] sm:$0xff] }
 0x8cc   : > { %4579 = vmatprep.subr.mxu0 %v1109_v24 }
 0x8d5   : > { %v4791_v32 = vpop.eup %4790 }
 0x8d6   : > { %4577 = vmatmul.mubr.msk.f32.vlgmr.msra.gmra.mrb[16].mxu0 %vm1742_vm4, %v4791_v32  ;;  %v3147_v23 = vsel %vm1742_vm4, %v4791_v32, 0.0 }
 0x8d7   : > { %3148 = vadd.xlane.f32.xlu0 %v3147_v23  ;;  %4580 = vmatpush3.msra.mxu0 %v1109_v24 }
 0x8d8   : > { %4633 = vmatprep.subr.bf16.mxu0 %v4632_v59 }
 0x919   : > { %v3146_v25 = vpop.xlane.xlu1 %3145 }
 0x91a   : > { %4792 = vrcp.f32 %v3146_v25 }
 0x924   : > { %v4793_v26 = vpop.eup %4792 }
 0x95e   : > { %v3226_v27 = vpop.f32.mrb[26].mxu1 }
 0x95f   : > { %v3306_v28 = vmul.f32 %v4793_v26, %v3226_v27  ;;  %v4573_v29 = vpop.f32.mrb[27].mxu1 }
 0x961   : > { %4581 = vmatprep.mubr.msk.f32.mxu0 %vm1742_vm4, %v3306_v28  ;;  %v4250_v28 = vld [vmem:[%s1071_s3] ss:$0 sm:$0xff]  ;;  %s5650_s3 = sld [smem:[#allocation13_spill]] }
 0x964   : > { %v3149_v30 = vpop.xlane.xlu0 %3148 }
 0x965   : > { %4794 = vrcp.f32 %v3149_v30  ;;  %v4251_v30 = vld [vmem:[%s1074_s11] ss:$0 sm:$0xff] }
 0x96f   : > { %v4795_v33 = vpop.eup %4794 }
 0x9a9   : > { %v3302_v34 = vpop.f32.mrb[16].mxu0 }
 0x9aa   : > { %v3307_v35 = vmul.f32 %v4795_v33, %v3302_v34  ;;  %v4578_v36 = vpop.f32.mrb[17].mxu0  ;;  %v1139_v33 = vld [vmem:[%s5112_s24] sm:$0xff]  ;;  %v1140_v34 = vld [vmem:[%s5112_s24 + $0x8] sm:$0xff] }
 0x9ab   : > { %v1172_v36 = vld [vmem:[%s5112_s24 + $0x108] sm:$0xff] }
 0x9ac   : > { %4582 = vmatmul.mubr.msk.f32.vlgmr.msra.gmra.mrb[10].mxu0 %vm1742_vm4, %v3307_v35  ;;  %v1171_v35 = vld [vmem:[%s5112_s24 + $0x100] sm:$0xff] }
 0x9ad   : > { %3612 = vmatprep.mubr.f32.mxu0 %v4874_v37  ;;  %4635 = vmatpush1.bf16.msra.mxu0 %v4634_v63  ;;  %v4682_v63 = vpack.c.bf16 %v1176_v62, %v1175_v61  ;;  %v1186_v61 = vld [vmem:[%s5112_s24 + $0x178] sm:$0xff] }
 0x9ae   : > { %4637 = vmatprep.subr.bf16.mxu0 %v4636_v6  ;;  %v4684_v6 = vpack.c.bf16 %v1194_v3, %v1193_v1  ;;  %v1138_v1 = vld [vmem:[%s5650_s3] sm:$0xf] }
 0x9b1   : > { %4639 = vmatpush1.bf16.msra.mxu0 %v4638_v12  ;;  %v4686_v12 = vpack.c.bf16 %v1178_v11, %v1177_v10 }
 0x9b2   : > { %4673 = vmatprep.subr.bf16.mxu0 %v4672_v19  ;;  %v1147_v19 = vld [vmem:[%s5112_s24 + $0x40] sm:$0xff] }
 0xa7f   : > { %v4583_v39 = vpop.f32.mrb[10].mxu0 }
 0xa80   : > { %v3380_v40 = vpop.f32.mrb[11].mxu0  ;;  %v3398_v41 = vadd.f32 %v4583_v39, %v4249_v38 }
 0xa81   : > { %v3397_v42 = vadd.f32 %v4249_v38, %v3380_v40  ;;  %v1157_v38 = vld [vmem:[%s5112_s24 + $0x90] sm:$0xff]  ;;  %v1158_v40 = vld [vmem:[%s5112_s24 + $0x98] sm:$0xff] }
 0xa82   : > { %v3400_v45 = vadd.f32 %v3398_v41, %v5145_v9  ;;  %v1189_v41 = vld [vmem:[%s5112_s24 + $0x190] sm:$0xff] }
 0xa83   : > { %v3399_v43 = vadd.f32 %v3397_v42, %v5141_v7  ;;  %v1190_v42 = vld [vmem:[%s5112_s24 + $0x198] sm:$0xff] }
 0xa84   : > { %v3404_v46 = vsel %vm1216_vm1, %v3400_v45, 0.0 }
 0xa85   : > { %v3401_v44 = vsel %vm1216_vm1, %v3399_v43, 0.0 }
 0xa86   : > { %3402 = vadd.xlane.f32.xlu1 %v3401_v44 }
 0xa8a   : > { %3405 = vadd.xlane.f32.xlu1 %v3404_v46  ;;  %v4642_v46 = vpack.c.bf16 %v1140_v34, %v1139_v33  ;;  %v1198_v33 = vld [vmem:[%s5112_s24 + $0x1d8] sm:$0xff]  ;;  %v1149_v34 = vld [vmem:[%s5112_s24 + $0x50] sm:$0xff] }
 0xb13   : > { %v3403_v47 = vpop.xlane.xlu1 %3402 }
 0xb14   : > { %v3408_v48 = vmul.f32 0.03125, %v3403_v47  ;;  %v4674_v47 = vpack.c.bf16 %v1172_v36, %v1171_v35  ;;  %v1150_v35 = vld [vmem:[%s5112_s24 + $0x58] sm:$0xff] }
 0xb16   : > { %v3410_v49 = vsub.f32 %v3399_v43, %v3408_v48  ;;  %v1141_v48 = vld [vmem:[%s5112_s24 + $0x10] sm:$0xff] }
 0xb17   : > { %v3406_v50 = vpop.xlane.xlu1 %3405 }
 0xb18   : > { %v3409_v51 = vmul.f32 0.03125, %v3406_v50  ;;  %v3412_v7 = vmul.f32 %v3410_v49, %v3410_v49  ;;  %v4644_v50 = vpack.c.bf16 %v1158_v40, %v1157_v38  ;;  %v4662_v38 = vpack.c.bf16 %v1150_v35, %v1149_v34  ;;  %v1182_v40 = vld [vmem:[%s5112_s24 + $0x158] sm:$0xff] }
 0xb1a   : > { %v5378_v52 = vsub.f32 %v3400_v45, %v3409_v51  ;;  %v3414_v9 = vsel %vm1216_vm1, %v3412_v7, 0.0  ;;  %v4676_v51 = vpack.c.bf16 %v1190_v42, %v1189_v41  ;;  %v1173_v7 = vld [vmem:[%s5112_s24 + $0x110] sm:$0xff]  ;;  %v1167_v42 = vld [vmem:[%s5112_s24 + $0xe0] sm:$0xff] }
 0xb1b   : > { %3415 = vadd.xlane.f32.xlu0 %v3414_v9  ;;  %v1174_v9 = vld [vmem:[%s5112_s24 + $0x118] sm:$0xff] }
 0xb1c   : > { %v3413_v53 = vmul.f32 %v5378_v52, %v5378_v52  ;;  %v4678_v18 = vpack.c.bf16 %v1174_v9, %v1173_v7  ;;  %v1183_v7 = vld [vmem:[%s5112_s24 + $0x160] sm:$0xff]  ;;  %v1184_v9 = vld [vmem:[%s5112_s24 + $0x168] sm:$0xff] }
 0xb1e   : > { %v3417_v54 = vsel %vm1216_vm1, %v3413_v53, 0.0  ;;  %v1159_v53 = vld [vmem:[%s5112_s24 + $0xa0] sm:$0xff] }
 0xb1f   : > { %3418 = vadd.xlane.f32.xlu1 %v3417_v54  ;;  %v4648_v16 = vpack.c.bf16 %v1160_v21, %v1159_v53  ;;  %v4698_v53 = vpack.c.bf16 %v1184_v9, %v1183_v7  ;;  %v1170_v21 = vld [vmem:[%s5112_s24 + $0xf8] sm:$0xff] }
 0xba8   : > { %v3416_v22 = vpop.xlane.xlu0 %3415 }
 0xba9   : > { %v3420_v32 = vmul.f32 0.03125, %v3416_v22  ;;  %v1148_v22 = vld [vmem:[%s5112_s24 + $0x48] sm:$0xff] }
 0xbab   : > { %v3422_v23 = vadd.f32 1e-05, %v3420_v32  ;;  %v4688_v32 = vpack.c.bf16 %v1196_v17, %v1195_v31 }
 0xbac   : > { %v3419_v24 = vpop.xlane.xlu1 %3418 }
 0xbad   : > { %4796 = vrsqrt.f32 %v3422_v23  ;;  %v3421_v25 = vmul.f32 0.03125, %v3419_v24  ;;  %v4658_v23 = vpack.c.bf16 %v1148_v22, %v1147_v19  ;;  %v1179_v24 = vld [vmem:[%s5112_s24 + $0x140] sm:$0xff] }
 0xbaf   : > { %v3423_v26 = vadd.f32 1e-05, %v3421_v25  ;;  %v1180_v25 = vld [vmem:[%s5112_s24 + $0x148] sm:$0xff] }
 0xbb1   : > { %4798 = vrsqrt.f32 %v3423_v26  ;;  %v4690_v26 = vpack.c.bf16 %v1180_v25, %v1179_v24 }
 0xbb7   : > { %v4797_v27 = vpop.eup %4796 }
 0xbb8   : > { %v3426_v29 = vmul.f32 %v4797_v27, %v3410_v49  ;;  %v1142_v49 = vld [vmem:[%s5112_s24 + $0x18] sm:$0xff]  ;;  %v1165_v27 = vld [vmem:[%s5112_s24 + $0xd0] sm:$0xff] }
 0xbb9   : > { %v4646_v57 = vpack.c.bf16 %v1142_v49, %v1141_v48  ;;  %v1151_v48 = vld [vmem:[%s5112_s24 + $0x60] sm:$0xff]  ;;  %v1152_v49 = vld [vmem:[%s5112_s24 + $0x68] sm:$0xff] }
 0xbba   : > { %v3434_v39 = vmul.f32 %v4250_v28, %v3426_v29  ;;  %v1197_v29 = vld [vmem:[%s5112_s24 + $0x1d0] sm:$0xff] }
 0xbbb   : > { %v4799_v43 = vpop.eup %4798  ;;  %v4692_v36 = vpack.c.bf16 %v1198_v33, %v1197_v29 }
 0xbbc   : > { %v5422_v44 = vadd.f32 %v4251_v30, %v3434_v39  ;;  %v3427_v45 = vmul.f32 %v4799_v43, %v5378_v52  ;;  %v1191_v52 = vld [vmem:[%s5112_s24 + $0x1a0] sm:$0xff]  ;;  %v1181_v39 = vld [vmem:[%s5112_s24 + $0x150] sm:$0xff]  ;;  %v1168_v43 = vld [vmem:[%s5112_s24 + $0xe8] sm:$0xff] }
 0xbbd   : > { %v4680_v59 = vpack.c.bf16 %v1192_v55, %v1191_v52  ;;  %v4694_v41 = vpack.c.bf16 %v1182_v40, %v1181_v39  ;;  %v1201_v52 = vld [vmem:[%s5112_s24 + $0x1f0] sm:$0xff] }
 0xbbe   : > { %4252 = vmatmul.mubr.msk.f32.vlgmr.msra.gmra.mrb[28].mxu1 %vm1216_vm1, %v5422_v44  ;;  %4254 = vmatmul.mubr.msk.f32.vlgmr.msra.gmra.mrb[18].mxu0 %vm1216_vm1, %v5422_v44  ;;  %v3435_v54 = vmul.f32 %v4250_v28, %v3427_v45  ;;  %v1166_v28 = vld [vmem:[%s5112_s24 + $0xd8] sm:$0xff]  ;;  %v1199_v45 = vld [vmem:[%s5112_s24 + $0x1e0] sm:$0xff] }
 0xbbf   : > { %3541 = vmatprep.mubr.f32.mxu1 %v4874_v37  ;;  %3618 = vmatprep.mubr.f32.mxu0 %v4874_v37  ;;  %v4650_v37 = vpack.c.bf16 %v1144_v60, %v1143_v58  ;;  %v1154_v58 = vld [vmem:[%s5112_s24 + $0x78] sm:$0xff]  ;;  %v1185_v60 = vld [vmem:[%s5112_s24 + $0x170] sm:$0xff] }
 0xbc0   : > { %v5439_v56 = vadd.f32 %v4251_v30, %v3435_v54  ;;  %4643 = vmatpush3.bf16.msra.mxu1 %v4642_v46  ;;  %4675 = vmatpush3.bf16.msra.mxu0 %v4674_v47  ;;  %v4660_v30 = vpack.c.bf16 %v1166_v28, %v1165_v27  ;;  %v4664_v46 = vpack.c.bf16 %v1168_v43, %v1167_v42  ;;  %v1200_v47 = vld [vmem:[%s5112_s24 + $0x1e8] sm:$0xff]  ;;  %v1169_v54 = vld [vmem:[%s5112_s24 + $0xf0] sm:$0xff] }
 0xbc1   : > { %4645 = vmatprep.subr.bf16.mxu1 %v4644_v50  ;;  %4677 = vmatprep.subr.bf16.mxu0 %v4676_v51  ;;  %v4696_v50 = vpack.c.bf16 %v1200_v47, %v1199_v45  ;;  %v4666_v51 = vpack.c.bf16 %v1152_v49, %v1151_v48  ;;  %v4668_v55 = vpack.c.bf16 %v1170_v21, %v1169_v54 }
 0xbc2   : > { %4253 = vmatmul.mubr.msk.f32.gmra.mrb[30].mxu1 %vm1216_vm1, %v5439_v56  ;;  %4255 = vmatmul.mubr.msk.f32.gmra.mrb[20].mxu0 %vm1216_vm1, %v5439_v56  ;;  %v4702_v62 = vpack.c.bf16 %v1186_v61, %v1185_v60 }
 0xbc4   : > { %4647 = vmatpush3.bf16.msra.mxu1 %v4646_v57  ;;  %4679 = vmatpush3.bf16.msra.mxu0 %v4678_v18  ;;  %v1202_v57 = vld [vmem:[%s5112_s24 + $0x1f8] sm:$0xff]  ;;  %v1153_v18 = vld [vmem:[%s5112_s24 + $0x70] sm:$0xff] }
 0xbc5   : > { %4649 = vmatprep.subr.bf16.mxu1 %v4648_v16  ;;  %4681 = vmatprep.subr.bf16.mxu0 %v4680_v59  ;;  %v4700_v16 = vpack.c.bf16 %v1202_v57, %v1201_v52  ;;  %v4670_v59 = vpack.c.bf16 %v1154_v58, %v1153_v18 }
 0xbc8   : > { %4651 = vmatpush3.bf16.msra.mxu1 %v4650_v37  ;;  %4683 = vmatpush3.bf16.msra.mxu0 %v4682_v63  ;;  %v3445_v37 = vlaneseq }
 0xbc9   : > { %4653 = vmatprep.subr.bf16.mxu1 %v4652_v2  ;;  %4685 = vmatprep.subr.bf16.mxu0 %v4684_v6 }
 0xbca   : > { %v3446_v63 = vshrl.u32 %v3445_v37, 7 }
 0xbcc   : > { %4655 = vmatpush3.bf16.msra.mxu1 %v4654_v8  ;;  %4687 = vmatpush3.bf16.msra.mxu0 %v4686_v12  ;;  %v3447_v20 = vsub.s32 0, %v3446_v63  ;;  %v3455_v0 = vsub.s32 2, %v3446_v63  ;;  %v3451_v2 = vsub.s32 1, %v3446_v63  ;;  %v3459_v3 = vsub.s32 3, %v3446_v63 }
 0xbcd   : > { %4657 = vmatprep.subr.bf16.mxu1 %v4656_v15  ;;  %4689 = vmatprep.subr.bf16.mxu0 %v4688_v32 }
 0xbce   : > { %v3448_v4 = vrot.slane %v1138_v1, %v3447_v20  ;;  %v3456_v5 = vrot.slane %v1138_v1, %v3455_v0  ;;  %v3452_v6 = vrot.slane %v1138_v1, %v3451_v2  ;;  %v3460_v8 = vrot.slane %v1138_v1, %v3459_v3 }
 0xbd0   : > { %4659 = vmatpush3.bf16.msra.mxu1 %v4658_v23  ;;  %4691 = vmatpush3.bf16.msra.mxu0 %v4690_v26 }
 0xbd1   : > { %4661 = vmatprep.subr.bf16.mxu1 %v4660_v30  ;;  %4693 = vmatprep.subr.bf16.mxu0 %v4692_v36 }
 0xbd4   : > { %4663 = vmatpush3.bf16.msra.mxu1 %v4662_v38  ;;  %4695 = vmatpush3.bf16.msra.mxu0 %v4694_v41 }
 0xbd5   : > { %4665 = vmatprep.subr.bf16.mxu1 %v4664_v46  ;;  %4697 = vmatprep.subr.bf16.mxu0 %v4696_v50 }
 0xbd8   : > { %4667 = vmatpush3.bf16.msra.mxu1 %v4666_v51  ;;  %4699 = vmatpush3.bf16.msra.mxu0 %v4698_v53 }
 0xbd9   : > { %4669 = vmatprep.subr.bf16.mxu1 %v4668_v55  ;;  %4701 = vmatprep.subr.bf16.mxu0 %v4700_v16 }
 0xbdc   : > { %4671 = vmatpush3.bf16.msra.mxu1 %v4670_v59  ;;  %4703 = vmatpush3.bf16.msra.mxu0 %v4702_v62 }
 0xc91   : > { %v3537_v10 = vpop.f32.mrb[28].mxu1  ;;  %v3614_v11 = vpop.f32.mrb[18].mxu0 }
 0xc92   : > { %v3538_v12 = vadd.f32 %v3537_v10, %v3448_v4  ;;  %v3615_v13 = vadd.f32 %v3614_v11, %v3456_v5  ;;  %v3539_v14 = vpop.f32.mrb[29].mxu1  ;;  %v3616_v31 = vpop.f32.mrb[19].mxu0 }
 0xc93   : > { %v3540_v15 = vadd.f32 %v3539_v14, %v3452_v6  ;;  %v3617_v17 = vadd.f32 %v3616_v31, %v3460_v8 }
 0xc94   : > { %v3633_v19 = vmul.f32 0.70710677, %v3538_v12  ;;  %v3635_v22 = vmul.f32 0.70710677, %v3615_v13  ;;  %v3625_v48 = vmul.f32 0.5, %v3538_v12  ;;  %v3627_v7 = vmul.f32 0.5, %v3615_v13 }
 0xc95   : > { %v3634_v32 = vmul.f32 0.70710677, %v3540_v15  ;;  %v3636_v23 = vmul.f32 0.70710677, %v3617_v17  ;;  %v3543_v24 = vpop.f32.mrb[30].mxu1  ;;  %v3620_v25 = vpop.f32.mrb[20].mxu0 }
 0xc96   : > { %4800 = verf.f32 %v3633_v19  ;;  %v3544_v26 = vadd.f32 %v3543_v24, %v3448_v4  ;;  %v3621_v27 = vadd.f32 %v3620_v25, %v3456_v5  ;;  %v3545_v28 = vpop.f32.mrb[31].mxu1  ;;  %v3622_v29 = vpop.f32.mrb[21].mxu0  ;;  %v3626_v46 = vmul.f32 0.5, %v3540_v15  ;;  %v4256_v4 = vld [vmem:[%s5652_s2] ss:$0 sm:$0xff] }
 0xc97   : > { %4802 = verf.f32 %v3635_v22  ;;  %v3546_v30 = vadd.f32 %v3545_v28, %v3452_v6  ;;  %v3623_v33 = vadd.f32 %v3622_v29, %v3460_v8  ;;  %v3628_v49 = vmul.f32 0.5, %v3617_v17 }
 0xc98   : > { %4804 = verf.f32 %v3634_v32  ;;  %v3637_v34 = vmul.f32 0.70710677, %v3544_v26  ;;  %v3639_v35 = vmul.f32 0.70710677, %v3621_v27  ;;  %v3629_v60 = vmul.f32 0.5, %v3544_v26 }
 0xc99   : > { %4806 = verf.f32 %v3636_v23  ;;  %v3638_v36 = vmul.f32 0.70710677, %v3546_v30  ;;  %v3640_v38 = vmul.f32 0.70710677, %v3623_v33  ;;  %v3630_v16 = vmul.f32 0.5, %v3546_v30 }
 0xc9a   : > { %4808 = verf.f32 %v3637_v34  ;;  %v3632_v61 = vmul.f32 0.5, %v3623_v33  ;;  %v3631_v37 = vmul.f32 0.5, %v3621_v27 }
 0xc9b   : > { %4810 = verf.f32 %v3639_v35 }
 0xc9c   : > { %4812 = verf.f32 %v3638_v36 }
 0xc9d   : > { %4814 = verf.f32 %v3640_v38 }
 0xca0   : > { %v4801_v39 = vpop.eup %4800 }
 0xca1   : > { %v4803_v40 = vpop.eup %4802  ;;  %v3649_v42 = vadd.f32 1.0, %v4801_v39 }
 0xca2   : > { %v4805_v41 = vpop.eup %4804  ;;  %v3651_v45 = vadd.f32 1.0, %v4803_v40 }
 0xca3   : > { %v4807_v43 = vpop.eup %4806  ;;  %v3650_v47 = vadd.f32 1.0, %v4805_v41  ;;  %v3657_v54 = vmul.f32 %v3649_v42, %v3625_v48  ;;  %v4258_v48 = vld [vmem:[%s1080_s19] ss:$0 sm:$0xff] }
 0xca4   : > { %v3652_v50 = vadd.f32 1.0, %v4807_v43  ;;  %v4809_v51 = vpop.eup %4808  ;;  %v3659_v55 = vmul.f32 %v3651_v45, %v3627_v7 }
 0xca5   : > { %v3658_v9 = vmul.f32 %v3650_v47, %v3626_v46  ;;  %v4811_v53 = vpop.eup %4810  ;;  %v3653_v57 = vadd.f32 1.0, %v4809_v51  ;;  %v4257_v46 = vld [vmem:[%s1077_s23] ss:$0 sm:$0xff] }
 0xca6   : > { %v3660_v21 = vmul.f32 %v3652_v50, %v3628_v49  ;;  %v4813_v52 = vpop.eup %4812  ;;  %v3655_v58 = vadd.f32 1.0, %v4811_v53 }
 0xca7   : > { %3735 = vmatprep.mubr.f32.mxu1 %v3658_v9  ;;  %v4815_v18 = vpop.eup %4814  ;;  %v3654_v59 = vadd.f32 1.0, %v4813_v52  ;;  %v3661_v0 = vmul.f32 %v3653_v57, %v3629_v60 }
 0xca8   : > { %3810 = vmatprep.mubr.f32.mxu0 %v3660_v21  ;;  %3736 = vmatmul.mubr.f32.vlgmr.msra.gmra.mrb[32].mxu1 %v3657_v54  ;;  %v3656_v62 = vadd.f32 1.0, %v4815_v18  ;;  %v3663_v1 = vmul.f32 %v3655_v58, %v3631_v37 }
 0xca9   : > { %3811 = vmatmul.mubr.f32.vlgmr.msra.gmra.mrb[22].mxu0 %v3659_v55  ;;  %v3662_v63 = vmul.f32 %v3654_v59, %v3630_v16 }
 0xcaa   : > { %v3664_v20 = vmul.f32 %v3656_v62, %v3632_v61 }
 0xcab   : > { %3740 = vmatprep.mubr.f32.mxu1 %v3662_v63 }
 0xcac   : > { %3815 = vmatprep.mubr.f32.mxu0 %v3664_v20  ;;  %3741 = vmatmul.mubr.f32.gmra.mrb[34].mxu1 %v3661_v0 }
 0xcad   : > { %3816 = vmatmul.mubr.f32.gmra.mrb[24].mxu0 %v3663_v1 }
 0xd7b   : > { %v4382_v2 = vpop.f32.mrb[32].mxu1 }
 0xd7c   : > { %v4420_v3 = vpop.f32.mrb[22].mxu0  ;;  %v4383_v5 = vpop.f32.mrb[33].mxu1 }
 0xd7d   : > { %v4384_v6 = vadd.f32 %v4383_v5, %v4382_v2  ;;  %v4421_v8 = vpop.f32.mrb[23].mxu0 }
 0xd7e   : > { %v4422_v10 = vadd.f32 %v4421_v8, %v4420_v3 }
 0xd7f   : > { %v3738_v11 = vadd.f32 %v4384_v6, %v4256_v4  ;;  %v4385_v12 = vpop.f32.mrb[34].mxu1 }
 0xd80   : > { %v4423_v14 = vpop.f32.mrb[24].mxu0  ;;  %v4386_v31 = vpop.f32.mrb[35].mxu1 }
 0xd81   : > { %v3813_v13 = vadd.f32 %v4422_v10, %v3738_v11  ;;  %v4387_v15 = vadd.f32 %v4386_v31, %v4385_v12  ;;  %v4424_v17 = vpop.f32.mrb[25].mxu0 }
 0xd82   : > { %v4425_v19 = vadd.f32 %v4424_v17, %v4423_v14 }
 0xd83   : > { %v3821_v22 = vadd.f32 %v3813_v13, %v5422_v44  ;;  %v3743_v32 = vadd.f32 %v4387_v15, %v4256_v4 }
 0xd85   : > { %v3823_v23 = vsel %vm1216_vm1, %v3821_v22, 0.0  ;;  %v3818_v24 = vadd.f32 %v4425_v19, %v3743_v32 }
 0xd86   : > { %3824 = vadd.xlane.f32.xlu0 %v3823_v23 }
 0xd87   : > { %v3822_v25 = vadd.f32 %v3818_v24, %v5439_v56 }
 0xd89   : > { %v3826_v26 = vsel %vm1216_vm1, %v3822_v25, 0.0 }
 0xd8a   : > { %3827 = vadd.xlane.f32.xlu1 %v3826_v26 }
 0xe13   : > { %v3825_v27 = vpop.xlane.xlu0 %3824 }
 0xe14   : > { %v3829_v28 = vmul.f32 0.03125, %v3825_v27 }
 0xe16   : > { %v3831_v29 = vsub.f32 %v3821_v22, %v3829_v28 }
 0xe17   : > { %v3828_v30 = vpop.xlane.xlu1 %3827 }
 0xe18   : > { %v3833_v33 = vmul.f32 %v3831_v29, %v3831_v29  ;;  %v3830_v34 = vmul.f32 0.03125, %v3828_v30 }
 0xe1a   : > { %v3835_v35 = vsel %vm1216_vm1, %v3833_v33, 0.0  ;;  %v3832_v44 = vsub.f32 %v3822_v25, %v3830_v34 }
 0xe1b   : > { %3836 = vadd.xlane.f32.xlu0 %v3835_v35 }
 0xe1c   : > { %v3834_v36 = vmul.f32 %v3832_v44, %v3832_v44 }
 0xe1e   : > { %v3838_v38 = vsel %vm1216_vm1, %v3834_v36, 0.0 }
 0xe1f   : > { %3839 = vadd.xlane.f32.xlu1 %v3838_v38 }
 0xea8   : > { %v3837_v56 = vpop.xlane.xlu0 %3836 }
 0xea9   : > { %v3841_v39 = vmul.f32 0.03125, %v3837_v56 }
 0xeab   : > { %v3843_v40 = vadd.f32 1e-05, %v3841_v39 }
 0xeac   : > { %v3840_v41 = vpop.xlane.xlu1 %3839 }
 0xead   : > { %4816 = vrsqrt.f32 %v3843_v40  ;;  %v3842_v42 = vmul.f32 0.03125, %v3840_v41 }
 0xeaf   : > { %v3844_v43 = vadd.f32 1e-05, %v3842_v42 }
 0xeb1   : > { %4818 = vrsqrt.f32 %v3844_v43 }
 0xeb7   : > { %v4817_v45 = vpop.eup %4816 }
 0xeb8   : > { %v3847_v47 = vmul.f32 %v4817_v45, %v3831_v29 }
 0xeba   : > { %v3855_v49 = vmul.f32 %v4257_v46, %v3847_v47  ;;  %3868 = sbr.rel (%p4259_p6) target bundleno = 3779 (0xec3), region = 120 }
 0xebb   : > { %v4819_v50 = vpop.eup %4818 }
 0xebc   : > { %v3863_v51 = vadd.f32 %v4258_v48, %v3855_v49  ;;  %v3848_v7 = vmul.f32 %v4819_v50, %v3832_v44 }
 0xebe   : > { %v3856_v9 = vmul.f32 %v4257_v46, %v3848_v7  ;;  %3869 = vst.msk [vmem:[#allocation2] sm:$0xff] (!%p4259_p6), %vm1216_vm1, %v3863_v51 }
 0xec0   : > { %v3864_v53 = vadd.f32 %v4258_v48, %v3856_v9 }
 0xec2   : > { %3870 = vst.msk [vmem:[#allocation2 + $0x8] sm:$0xff] %vm1216_vm1, %v3864_v53 }
 0xec3 PF: > { %s5656_s23 = sld [smem:[#allocation6_spill]] }
 0xec9   : > { %p4260_p7 = scmp.ne.s32.totalorder %s5656_s23, 1 }
 0xeca   : > { %3875 = vst.msk [vmem:[#allocation3] sm:$0xff] (!%p4260_p7), %vm1216_vm1, %v3863_v51  ;;  %3876 = vst.msk [vmem:[#allocation3 + $0x8] sm:$0xff] (!%p4260_p7), %vm1216_vm1, %v3864_v53 }
 0xecb   : > { %3874 = sbr.rel (%p4260_p7) target bundleno = 3794 (0xed2), region = 124 }
 0xed2 PF: > { %s5657_s1 = sld [smem:[#allocation8_spill]]  ;;  %s4879_s0 = smov [#allocation3]  }
 0xed3   : > { %s3886_s6 = sshll.u32 %s4879_s0, 4  ;;  %s3887_s6 = int_to_ptr.vmem [resolvable:$true] %s3886_s6 }
 0xed4   : > { %s4820_s9 = scalar_lea.vmem %s3887_s6, 256  ;;  %p4827_p12 = scmp.lt.s32.totalorder %s3887_s6, %s3887_s6 }
 0xed5   : > { %p4821_p9 = scmp.ne.s32.totalorder %s3887_s6, %s4820_s9  ;;  %p4828_p13 = scmp.lt.s32.totalorder %s4820_s9, %s4820_s9 }
 0xed7   : > { %p4829_p0 = por %p4828_p13, %p4827_p12 }
 0xed8   : > { %s5658_s19 = sadd.s32 4294967295, %s5657_s1  }
 0xed9   : > { %p5519_p8 = scmp.eq.s32.totalorder %s5658_s19, 1 }
 0xedb   : > { %p4822_p10 = pnand %p4821_p9, %p5519_p8 }
 0xedd   : > { %p4823_p11 = pneg %p4822_p10 }
 0xedf   : > { %p4830_p1 = pnand %p4829_p0, %p4823_p11 }
 0xee1   : > { %4833 = shalt.err (!%p4830_p1)
}
 0xee2   : > { %s5660_s28 = sld [smem:[#allocation33_spill]] }
 0xee8   : > { %s4834_s4 = scalar_lea.hbm %s5660_s28, 256 }
 0xee9   : > { %p4835_p2 = scmp.ne.s32.totalorder %s5660_s28, %s4834_s4  ;;  %p4840_p5 = scmp.lt.u32.totalorder %s4834_s4, %s5660_s28 }
 0xeeb   : > { %p4836_p3 = pnand %p4835_p2, %p5519_p8 }
 0xeed   : > { %p4837_p4 = pneg %p4836_p3 }
 0xeef   : > { %p4842_p6 = pnand %p4840_p5, %p4837_p4 }
 0xef1   : > { %4845 = shalt.err (!%p4842_p6)
}
 0xef2   : > { %s4880_s24 = smov 128   ;;  %s4881_s11 = smov 8  }
 0xef3   : > { %4711 = dma.vmem_to_hbm [thread:$0]  (%p5519_p8), %s3887_s6, 256, %s5660_s28, [#allocation4], %s4880_s24, %s4880_s24, %s4881_s11  }
 0xef4   : > { %4859 = dma.done.wait (%p5519_p8), [#allocation4], 256  }
 0xef5   : > { %4861 = vsyncadd (%p5519_p8), [#allocation4], 4294967040 }
 0xef6 PF: > { %s5661_s8 = sld [smem:[#allocation8_spill]]  ;;  %s5662_s4 = sld [smem:[#allocation7_spill]] }
 0xef7   : > { %s5663_s30 = sld [smem:[#allocation9_spill]] }
 0xefc   : > { %s34_s24 = sadd.s32 1, %s5661_s8  }
 0xefd   : > { %p31_p7 = scmp.ge.s32.totalorder %s34_s24, 4  }
 0xeff   :  { %33 = sbr.rel (!%p31_p7) target bundleno = 23 (0x17), region = 218 }
 0xf06   :  { %3902 = vsyncpa [#allocation4], 1 }
 0xf07   :  { %3904 = vsyncpa [#allocation4 + $0x1], 1 }

</bundles_post_ra>
